<compile_context>
chip_gen: v7x
topology: tpu7x:2x2x1
jax: 0.10.0
libtpu: 0.0.40
codegen_flags: <defaults>
</compile_context>

<pallas_src>
from functools import partial

import numpy as np
import jax
import jax.numpy as jnp
from jax import lax
from jax.experimental import pallas as pl
from jax.experimental.pallas import tpu as pltpu


def bottleneck_kernel(x_ref, w1_ref, b1_ref, w2_ref, b2_ref, w3_ref, b3_ref,
                      o_ref, col_ref, *, H, W):
    # x_ref:  (1, H*W, Cin) bf16        o_ref: (1, H*W, Cin) bf16
    # w1_ref: (Cin, P)  w2_ref: (9P, P)  w3_ref: (P, Cin)  (bf16, BN scale folded)
    # b*_ref: (1, P) / (1, Cin) f32      col_ref: (H*W, 9P) bf16 scratch (im2col)
    Cin, P = w1_ref.shape
    HW = H * W
    bf16 = jnp.bfloat16

    # ---- stage 1: 1x1 conv (+ folded BN scale) + bias + ReLU ----------------
    out1 = jnp.dot(x_ref[0], w1_ref[...], preferred_element_type=jnp.float32)
    out1 = jnp.maximum(out1 + b1_ref[...], 0.0)                 # (HW, P) f32
    # Cast to bf16 ONCE before building taps (halves im2col copy width).
    out1_bf = out1.astype(bf16).reshape(H, W, P)

    # ---- stage 2: 3x3 conv (pad=1, stride=1) as ONE im2col matmul, K = 9P ---
    # Pad once (two concats total), then take 9 static slices.
    zrow = jnp.zeros((1, W, P), bf16)
    zcol = jnp.zeros((H + 2, 1, P), bf16)
    padded = jnp.concatenate([zrow, out1_bf, zrow], axis=0)     # (H+2, W,   P)
    padded = jnp.concatenate([zcol, padded, zcol], axis=1)      # (H+2, W+2, P)

    for dy in range(3):
        for dx in range(3):
            t = dy * 3 + dx
            # tap[h, w, :] = out1[h + dy - 1, w + dx - 1, :]  (zero padded)
            tap = padded[dy:dy + H, dx:dx + W, :].reshape(HW, P)
            col_ref[:, t * P:(t + 1) * P] = tap                 # bf16 store

    out2 = jnp.dot(col_ref[...], w2_ref[...],
                   preferred_element_type=jnp.float32)          # (HW, P) f32
    out2 = jnp.maximum(out2 + b2_ref[...], 0.0)

    # ---- stage 3: 1x1 expansion conv + bias + identity residual + ReLU ------
    out3 = jnp.dot(out2.astype(bf16), w3_ref[...],
                   preferred_element_type=jnp.float32)          # (HW, Cin) f32
    # Re-read x from the resident input buffer for the residual (keeps x out of
    # live registers across the two large matmuls above).
    out3 = out3 + b3_ref[...] + x_ref[0].astype(jnp.float32)
    out3 = jnp.maximum(out3, 0.0)

    o_ref[0] = out3.astype(o_ref.dtype)                         # bf16, lane-dense


def bottleneck_forward(x, w1, b1, w2, b2, w3, b3):
    """x: (N,H,W,Cin) bf16.  w1:(Cin,P), w2:(3,3,P,P), w3:(P,Cin) bf16 with the
    BN scale already folded into output channels.  b1,b2:(P,), b3:(Cin,) f32.
    Returns (N,H,W,Cin) bf16."""
    N, H, W, Cin = x.shape
    P = w1.shape[1]
    assert Cin == 4 * P, "identity residual requires inplanes == planes * 4"

    x_flat = x.reshape(N, H * W, Cin)          # lane-dense activation slabs
    w2_flat = w2.reshape(9 * P, P)             # (dy, dx, cin) flattened -> K
    b1 = b1.reshape(1, P).astype(jnp.float32)
    b2 = b2.reshape(1, P).astype(jnp.float32)
    b3 = b3.reshape(1, Cin).astype(jnp.float32)

    def const_spec(shape):
        # Constant index_map across the grid -> single-buffered (no refetch,
        # no pointless double buffering of weights).
        nd = len(shape)
        return pl.BlockSpec(shape, lambda n, _nd=nd: (0,) * _nd,
                            pipeline_mode=pl.Buffered(1))

    out = pl.pallas_call(
        partial(bottleneck_kernel, H=H, W=W),
        out_shape=jax.ShapeDtypeStruct((N, H * W, Cin), jnp.bfloat16),
        grid_spec=pltpu.PrefetchScalarGridSpec(
            num_scalar_prefetch=0,
            grid=(N,),
            in_specs=[
                pl.BlockSpec((1, H * W, Cin), lambda n: (n, 0, 0)),   # x
                const_spec((Cin, P)), const_spec((1, P)),             # conv1/bn1
                const_spec((9 * P, P)), const_spec((1, P)),           # conv2/bn2
                const_spec((P, Cin)), const_spec((1, Cin)),           # conv3/bn3
            ],
            out_specs=pl.BlockSpec((1, H * W, Cin), lambda n: (n, 0, 0)),
            scratch_shapes=[pltpu.VMEM((H * W, 9 * P), jnp.bfloat16)],
        ),
        compiler_params=pltpu.CompilerParams(
            dimension_semantics=("parallel",),
            vmem_limit_bytes=64 * 1024 * 1024),
    )(x_flat, w1, b1, w2_flat, b2, w3, b3)
    return out.reshape(N, H, W, Cin)


def fold_bn(gamma, beta, mean, var, eps=1e-5):
    scale = gamma / jnp.sqrt(var + eps)
    bias = beta - mean * scale
    return scale, bias


def ref_forward(x_bf, w1f, b1, w2f, b2, w3f, b3):
    """Pure-JAX reference (NHWC / HWIO), matching the kernel's bf16 rounding points."""
    f32 = jnp.float32
    x = x_bf.astype(f32)
    dn = ("NHWC", "HWIO", "NHWC")
    o = lax.conv_general_dilated(x, w1f.astype(f32)[None, None], (1, 1), "VALID",
                                 dimension_numbers=dn)
    o = jnp.maximum(o + b1, 0.0).astype(jnp.bfloat16).astype(f32)
    o = lax.conv_general_dilated(o, w2f.astype(f32), (1, 1), ((1, 1), (1, 1)),
                                 dimension_numbers=dn)
    o = jnp.maximum(o + b2, 0.0).astype(jnp.bfloat16).astype(f32)
    o = lax.conv_general_dilated(o, w3f.astype(f32)[None, None], (1, 1), "VALID",
                                 dimension_numbers=dn)
    return jnp.maximum(o + b3 + x, 0.0)


if __name__ == "__main__":
    # Small shapes consistent with the module: inplanes = planes * expansion.
    # Cin = 128 so activation blocks map exactly onto the 128-lane axis.
    N, H, W = 2, 8, 8
    planes = 32
    inplanes = planes * 4          # 128

    key = jax.random.PRNGKey(0)
    keys = jax.random.split(key, 16)

    x = jax.random.normal(keys[0], (N, H, W, inplanes), jnp.float32)

    # Conv weights stored HWIO-style (a PyTorch port would transpose OIHW -> HWIO).
    w1 = jax.random.normal(keys[1], (inplanes, planes), jnp.float32) * 0.1
    w2 = jax.random.normal(keys[2], (3, 3, planes, planes), jnp.float32) * 0.1
    w3 = jax.random.normal(keys[3], (planes, inplanes), jnp.float32) * 0.1

    def bn_params(kg, kb, km, kv, c):
        gamma = 1.0 + 0.1 * jax.random.normal(kg, (c,), jnp.float32)
        beta = 0.1 * jax.random.normal(kb, (c,), jnp.float32)
        mean = 0.1 * jax.random.normal(km, (c,), jnp.float32)
        var = jax.random.uniform(kv, (c,), jnp.float32, 0.5, 1.5)
        return fold_bn(gamma, beta, mean, var)

    s1, b1 = bn_params(keys[4], keys[5], keys[6], keys[7], planes)
    s2, b2 = bn_params(keys[8], keys[9], keys[10], keys[11], planes)
    s3, b3 = bn_params(keys[12], keys[13], keys[14], keys[15], inplanes)

    # Fold the BN scale into the conv output channels offline; cast to bf16.
    w1f = (w1 * s1[None, :]).astype(jnp.bfloat16)
    w2f = (w2 * s2[None, None, None, :]).astype(jnp.bfloat16)
    w3f = (w3 * s3[None, :]).astype(jnp.bfloat16)
    x_bf = x.astype(jnp.bfloat16)

    out = bottleneck_forward(x_bf, w1f, b1, w2f, b2, w3f, b3)
    out = jax.block_until_ready(out)

    expected = ref_forward(x_bf, w1f, b1, w2f, b2, w3f, b3)
    expected_bf = expected.astype(jnp.bfloat16).astype(jnp.float32)
    np.testing.assert_allclose(np.asarray(out.astype(jnp.float32)),
                               np.asarray(expected_bf),
                               rtol=2e-2, atol=2e-2)

    print("KERNEL_OK")
</pallas_src>

<mosaic_0001>
module attributes {stable_mosaic.version = 11 : i64} {
  func.func @bottleneck_kernel(%arg0: i32, %arg1: memref<1x64x128xbf16, #tpu.memory_space<vmem>>, %arg2: memref<128x32xbf16, #tpu.memory_space<vmem>>, %arg3: memref<1x32xf32, #tpu.memory_space<vmem>>, %arg4: memref<288x32xbf16, #tpu.memory_space<vmem>>, %arg5: memref<1x32xf32, #tpu.memory_space<vmem>>, %arg6: memref<32x128xbf16, #tpu.memory_space<vmem>>, %arg7: memref<1x128xf32, #tpu.memory_space<vmem>>, %arg8: memref<1x64x128xbf16, #tpu.memory_space<vmem>>, %arg9: memref<64x288xbf16, #tpu.memory_space<vmem>>) attributes {dimension_semantics = [#tpu.dimension_semantics<parallel>], iteration_bounds = array<i64: 2>, scalar_prefetch = 0 : i64, scratch_operands = 1 : i64, tpu.core_type = #tpu.core_type<tc>, window_params = [{transform_indices = @transform_0, window_bounds = array<i64: 1, 64, 128>}, {pipeline_mode = #tpu.pipeline_mode<synchronous>, transform_indices = @transform_1, window_bounds = array<i64: 128, 32>}, {pipeline_mode = #tpu.pipeline_mode<synchronous>, transform_indices = @transform_2, window_bounds = array<i64: 1, 32>}, {pipeline_mode = #tpu.pipeline_mode<synchronous>, transform_indices = @transform_3, window_bounds = array<i64: 288, 32>}, {pipeline_mode = #tpu.pipeline_mode<synchronous>, transform_indices = @transform_4, window_bounds = array<i64: 1, 32>}, {pipeline_mode = #tpu.pipeline_mode<synchronous>, transform_indices = @transform_5, window_bounds = array<i64: 32, 128>}, {pipeline_mode = #tpu.pipeline_mode<synchronous>, transform_indices = @transform_6, window_bounds = array<i64: 1, 128>}, {transform_indices = @transform_7, window_bounds = array<i64: 1, 64, 128>}]} {
    %c0 = arith.constant 0 : index
    %c0_0 = arith.constant 0 : index
    %c0_1 = arith.constant 0 : index
    %0 = vector.load %arg1[%c0, %c0_0, %c0_1] : memref<1x64x128xbf16, #tpu.memory_space<vmem>>, vector<1x64x128xbf16>
    %1 = vector.shape_cast %0 : vector<1x64x128xbf16> to vector<64x128xbf16>
    %c0_2 = arith.constant 0 : index
    %c0_3 = arith.constant 0 : index
    %2 = vector.load %arg2[%c0_2, %c0_3] : memref<128x32xbf16, #tpu.memory_space<vmem>>, vector<128x32xbf16>
    %cst = arith.constant dense<0.000000e+00> : vector<64x32xf32>
    %3 = tpu.matmul %1, %2, %cst {dimension_numbers = #tpu.dot_dimension_numbers<[1], [0], [0], [1], [0, 0, 1, 1], [], []>} : vector<64x128xbf16>, vector<128x32xbf16>, vector<64x32xf32> -> vector<64x32xf32>
    %c0_4 = arith.constant 0 : index
    %c0_5 = arith.constant 0 : index
    %4 = vector.load %arg3[%c0_4, %c0_5] : memref<1x32xf32, #tpu.memory_space<vmem>>, vector<1x32xf32>
    %5 = vector.broadcast %4 : vector<1x32xf32> to vector<64x32xf32>
    %6 = arith.addf %3, %5 : vector<64x32xf32>
    %cst_6 = arith.constant 0.000000e+00 : f32
    %7 = vector.broadcast %cst_6 : f32 to vector<64x32xf32>
    %8 = arith.maximumf %6, %7 : vector<64x32xf32>
    %9 = arith.truncf %8 : vector<64x32xf32> to vector<64x32xbf16>
    %10 = vector.shape_cast %9 : vector<64x32xbf16> to vector<8x8x32xbf16>
    %cst_7 = arith.constant 0.000000e+00 : bf16
    %11 = vector.broadcast %cst_7 : bf16 to vector<1x8x32xbf16>
    %cst_8 = arith.constant 0.000000e+00 : bf16
    %12 = vector.broadcast %cst_8 : bf16 to vector<10x1x32xbf16>
    %13 = tpu.concatenate %11, %10, %11 in 0 : vector<1x8x32xbf16>, vector<8x8x32xbf16>, vector<1x8x32xbf16> -> vector<10x8x32xbf16>
    %14 = tpu.concatenate %12, %13, %12 in 1 : vector<10x1x32xbf16>, vector<10x8x32xbf16>, vector<10x1x32xbf16> -> vector<10x10x32xbf16>
    %15 = vector.extract_strided_slice %14 {offsets = [0, 0, 0], sizes = [8, 8, 32], strides = [1, 1, 1]} : vector<10x10x32xbf16> to vector<8x8x32xbf16>
    %16 = vector.shape_cast %15 : vector<8x8x32xbf16> to vector<64x32xbf16>
    %c0_9 = arith.constant 0 : index
    %c0_10 = arith.constant 0 : index
    %17 = vector.load %arg9[%c0_9, %c0_10] : memref<64x288xbf16, #tpu.memory_space<vmem>>, vector<64x32xbf16>
    tpu.vector_store %arg9[%c0_9, %c0_10], %16 {strides = array<i32>} : memref<64x288xbf16, #tpu.memory_space<vmem>>, vector<64x32xbf16>,
    %18 = vector.extract_strided_slice %14 {offsets = [0, 1, 0], sizes = [8, 8, 32], strides = [1, 1, 1]} : vector<10x10x32xbf16> to vector<8x8x32xbf16>
    %19 = vector.shape_cast %18 : vector<8x8x32xbf16> to vector<64x32xbf16>
    %c0_11 = arith.constant 0 : index
    %c32 = arith.constant 32 : index
    %20 = vector.load %arg9[%c0_11, %c32] : memref<64x288xbf16, #tpu.memory_space<vmem>>, vector<64x32xbf16>
    tpu.vector_store %arg9[%c0_11, %c32], %19 {strides = array<i32>} : memref<64x288xbf16, #tpu.memory_space<vmem>>, vector<64x32xbf16>,
    %21 = vector.extract_strided_slice %14 {offsets = [0, 2, 0], sizes = [8, 8, 32], strides = [1, 1, 1]} : vector<10x10x32xbf16> to vector<8x8x32xbf16>
    %22 = vector.shape_cast %21 : vector<8x8x32xbf16> to vector<64x32xbf16>
    %c0_12 = arith.constant 0 : index
    %c64 = arith.constant 64 : index
    %23 = vector.load %arg9[%c0_12, %c64] : memref<64x288xbf16, #tpu.memory_space<vmem>>, vector<64x32xbf16>
    tpu.vector_store %arg9[%c0_12, %c64], %22 {strides = array<i32>} : memref<64x288xbf16, #tpu.memory_space<vmem>>, vector<64x32xbf16>,
    %24 = vector.extract_strided_slice %14 {offsets = [1, 0, 0], sizes = [8, 8, 32], strides = [1, 1, 1]} : vector<10x10x32xbf16> to vector<8x8x32xbf16>
    %25 = vector.shape_cast %24 : vector<8x8x32xbf16> to vector<64x32xbf16>
    %c0_13 = arith.constant 0 : index
    %c96 = arith.constant 96 : index
    %26 = vector.load %arg9[%c0_13, %c96] : memref<64x288xbf16, #tpu.memory_space<vmem>>, vector<64x32xbf16>
    tpu.vector_store %arg9[%c0_13, %c96], %25 {strides = array<i32>} : memref<64x288xbf16, #tpu.memory_space<vmem>>, vector<64x32xbf16>,
    %27 = vector.extract_strided_slice %14 {offsets = [1, 1, 0], sizes = [8, 8, 32], strides = [1, 1, 1]} : vector<10x10x32xbf16> to vector<8x8x32xbf16>
    %28 = vector.shape_cast %27 : vector<8x8x32xbf16> to vector<64x32xbf16>
    %c0_14 = arith.constant 0 : index
    %c128 = arith.constant 128 : index
    %29 = vector.load %arg9[%c0_14, %c128] : memref<64x288xbf16, #tpu.memory_space<vmem>>, vector<64x32xbf16>
    tpu.vector_store %arg9[%c0_14, %c128], %28 {strides = array<i32>} : memref<64x288xbf16, #tpu.memory_space<vmem>>, vector<64x32xbf16>,
    %30 = vector.extract_strided_slice %14 {offsets = [1, 2, 0], sizes = [8, 8, 32], strides = [1, 1, 1]} : vector<10x10x32xbf16> to vector<8x8x32xbf16>
    %31 = vector.shape_cast %30 : vector<8x8x32xbf16> to vector<64x32xbf16>
    %c0_15 = arith.constant 0 : index
    %c160 = arith.constant 160 : index
    %32 = vector.load %arg9[%c0_15, %c160] : memref<64x288xbf16, #tpu.memory_space<vmem>>, vector<64x32xbf16>
    tpu.vector_store %arg9[%c0_15, %c160], %31 {strides = array<i32>} : memref<64x288xbf16, #tpu.memory_space<vmem>>, vector<64x32xbf16>,
    %33 = vector.extract_strided_slice %14 {offsets = [2, 0, 0], sizes = [8, 8, 32], strides = [1, 1, 1]} : vector<10x10x32xbf16> to vector<8x8x32xbf16>
    %34 = vector.shape_cast %33 : vector<8x8x32xbf16> to vector<64x32xbf16>
    %c0_16 = arith.constant 0 : index
    %c192 = arith.constant 192 : index
    %35 = vector.load %arg9[%c0_16, %c192] : memref<64x288xbf16, #tpu.memory_space<vmem>>, vector<64x32xbf16>
    tpu.vector_store %arg9[%c0_16, %c192], %34 {strides = array<i32>} : memref<64x288xbf16, #tpu.memory_space<vmem>>, vector<64x32xbf16>,
    %36 = vector.extract_strided_slice %14 {offsets = [2, 1, 0], sizes = [8, 8, 32], strides = [1, 1, 1]} : vector<10x10x32xbf16> to vector<8x8x32xbf16>
    %37 = vector.shape_cast %36 : vector<8x8x32xbf16> to vector<64x32xbf16>
    %c0_17 = arith.constant 0 : index
    %c224 = arith.constant 224 : index
    %38 = vector.load %arg9[%c0_17, %c224] : memref<64x288xbf16, #tpu.memory_space<vmem>>, vector<64x32xbf16>
    tpu.vector_store %arg9[%c0_17, %c224], %37 {strides = array<i32>} : memref<64x288xbf16, #tpu.memory_space<vmem>>, vector<64x32xbf16>,
    %39 = vector.extract_strided_slice %14 {offsets = [2, 2, 0], sizes = [8, 8, 32], strides = [1, 1, 1]} : vector<10x10x32xbf16> to vector<8x8x32xbf16>
    %40 = vector.shape_cast %39 : vector<8x8x32xbf16> to vector<64x32xbf16>
    %c0_18 = arith.constant 0 : index
    %c256 = arith.constant 256 : index
    %41 = vector.load %arg9[%c0_18, %c256] : memref<64x288xbf16, #tpu.memory_space<vmem>>, vector<64x32xbf16>
    tpu.vector_store %arg9[%c0_18, %c256], %40 {strides = array<i32>} : memref<64x288xbf16, #tpu.memory_space<vmem>>, vector<64x32xbf16>,
    %c0_19 = arith.constant 0 : index
    %c0_20 = arith.constant 0 : index
    %42 = vector.load %arg9[%c0_19, %c0_20] : memref<64x288xbf16, #tpu.memory_space<vmem>>, vector<64x288xbf16>
    %c0_21 = arith.constant 0 : index
    %c0_22 = arith.constant 0 : index
    %43 = vector.load %arg4[%c0_21, %c0_22] : memref<288x32xbf16, #tpu.memory_space<vmem>>, vector<288x32xbf16>
    %cst_23 = arith.constant dense<0.000000e+00> : vector<64x32xf32>
    %44 = tpu.matmul %42, %43, %cst_23 {dimension_numbers = #tpu.dot_dimension_numbers<[1], [0], [0], [1], [0, 0, 1, 1], [], []>} : vector<64x288xbf16>, vector<288x32xbf16>, vector<64x32xf32> -> vector<64x32xf32>
    %c0_24 = arith.constant 0 : index
    %c0_25 = arith.constant 0 : index
    %45 = vector.load %arg5[%c0_24, %c0_25] : memref<1x32xf32, #tpu.memory_space<vmem>>, vector<1x32xf32>
    %46 = vector.broadcast %45 : vector<1x32xf32> to vector<64x32xf32>
    %47 = arith.addf %44, %46 : vector<64x32xf32>
    %cst_26 = arith.constant 0.000000e+00 : f32
    %48 = vector.broadcast %cst_26 : f32 to vector<64x32xf32>
    %49 = arith.maximumf %47, %48 : vector<64x32xf32>
    %50 = arith.truncf %49 : vector<64x32xf32> to vector<64x32xbf16>
    %c0_27 = arith.constant 0 : index
    %c0_28 = arith.constant 0 : index
    %51 = vector.load %arg6[%c0_27, %c0_28] : memref<32x128xbf16, #tpu.memory_space<vmem>>, vector<32x128xbf16>
    %cst_29 = arith.constant dense<0.000000e+00> : vector<64x128xf32>
    %52 = tpu.matmul %50, %51, %cst_29 {dimension_numbers = #tpu.dot_dimension_numbers<[1], [0], [0], [1], [0, 0, 1, 1], [], []>} : vector<64x32xbf16>, vector<32x128xbf16>, vector<64x128xf32> -> vector<64x128xf32>
    %c0_30 = arith.constant 0 : index
    %c0_31 = arith.constant 0 : index
    %53 = vector.load %arg7[%c0_30, %c0_31] : memref<1x128xf32, #tpu.memory_space<vmem>>, vector<1x128xf32>
    %54 = vector.broadcast %53 : vector<1x128xf32> to vector<64x128xf32>
    %55 = arith.addf %52, %54 : vector<64x128xf32>
    %c0_32 = arith.constant 0 : index
    %c0_33 = arith.constant 0 : index
    %c0_34 = arith.constant 0 : index
    %56 = vector.load %arg1[%c0_32, %c0_33, %c0_34] : memref<1x64x128xbf16, #tpu.memory_space<vmem>>, vector<1x64x128xbf16>
    %57 = vector.shape_cast %56 : vector<1x64x128xbf16> to vector<64x128xbf16>
    %58 = arith.extf %57 : vector<64x128xbf16> to vector<64x128xf32>
    %59 = arith.addf %55, %58 : vector<64x128xf32>
    %cst_35 = arith.constant 0.000000e+00 : f32
    %60 = vector.broadcast %cst_35 : f32 to vector<64x128xf32>
    %61 = arith.maximumf %59, %60 : vector<64x128xf32>
    %62 = arith.truncf %61 : vector<64x128xf32> to vector<64x128xbf16>
    %c0_36 = arith.constant 0 : index
    %c0_37 = arith.constant 0 : index
    %c0_38 = arith.constant 0 : index
    %63 = vector.load %arg8[%c0_36, %c0_37, %c0_38] : memref<1x64x128xbf16, #tpu.memory_space<vmem>>, vector<1x64x128xbf16>
    %64 = vector.shape_cast %63 : vector<1x64x128xbf16> to vector<64x128xbf16>
    %65 = vector.shape_cast %62 : vector<64x128xbf16> to vector<1x64x128xbf16>
    tpu.vector_store %arg8[%c0_36, %c0_37, %c0_38], %65 {strides = array<i32>} : memref<1x64x128xbf16, #tpu.memory_space<vmem>>, vector<1x64x128xbf16>,
    return
  }
  func.func @transform_0(%arg0: i32) -> (i32, i32, i32) {
    %c0_i32 = arith.constant 0 : i32
    %c0_i32_0 = arith.constant 0 : i32
    %c0_i32_1 = arith.constant 0 : i32
    return %arg0, %c0_i32, %c0_i32_0 : i32, i32, i32
  }
  func.func @transform_1(%arg0: i32) -> (i32, i32) {
    %c0_i32 = arith.constant 0 : i32
    %c0_i32_0 = arith.constant 0 : i32
    %c0_i32_1 = arith.constant 0 : i32
    return %c0_i32, %c0_i32_0 : i32, i32
  }
  func.func @transform_2(%arg0: i32) -> (i32, i32) {
    %c0_i32 = arith.constant 0 : i32
    %c0_i32_0 = arith.constant 0 : i32
    %c0_i32_1 = arith.constant 0 : i32
    return %c0_i32, %c0_i32_0 : i32, i32
  }
  func.func @transform_3(%arg0: i32) -> (i32, i32) {
    %c0_i32 = arith.constant 0 : i32
    %c0_i32_0 = arith.constant 0 : i32
    %c0_i32_1 = arith.constant 0 : i32
    return %c0_i32, %c0_i32_0 : i32, i32
  }
  func.func @transform_4(%arg0: i32) -> (i32, i32) {
    %c0_i32 = arith.constant 0 : i32
    %c0_i32_0 = arith.constant 0 : i32
    %c0_i32_1 = arith.constant 0 : i32
    return %c0_i32, %c0_i32_0 : i32, i32
  }
  func.func @transform_5(%arg0: i32) -> (i32, i32) {
    %c0_i32 = arith.constant 0 : i32
    %c0_i32_0 = arith.constant 0 : i32
    %c0_i32_1 = arith.constant 0 : i32
    return %c0_i32, %c0_i32_0 : i32, i32
  }
  func.func @transform_6(%arg0: i32) -> (i32, i32) {
    %c0_i32 = arith.constant 0 : i32
    %c0_i32_0 = arith.constant 0 : i32
    %c0_i32_1 = arith.constant 0 : i32
    return %c0_i32, %c0_i32_0 : i32, i32
  }
  func.func @transform_7(%arg0: i32) -> (i32, i32, i32) {
    %c0_i32 = arith.constant 0 : i32
    %c0_i32_0 = arith.constant 0 : i32
    %c0_i32_1 = arith.constant 0 : i32
    return %arg0, %c0_i32, %c0_i32_0 : i32, i32, i32
  }
}

</mosaic_0001>

<bundles_post_ra>
// kernel: tpu_custom_call.1
= control target key start
LH: loop header
LB: loop body
LE: loop exit
PB: predicated region body
PF: predicated region fallthrough
CT: control target
= control target key end

     0   :  { %12 = vsyncpa [#allocation4], 0  ;;  %s3152_s0 = inlined_call_operand.hbm [shape: bf16[2,64,128], index: 0, kind: input, shape index: {}]   ;;  %s3153_s1 = inlined_call_operand.hbm [shape: bf16[128,32], index: 1, kind: input, shape index: {}]   ;;  %s3154_s2 = inlined_call_operand.hbm [shape: f32[1,32], index: 2, kind: input, shape index: {}]   ;;  %s3155_s3 = inlined_call_operand.hbm [shape: bf16[288,32], index: 3, kind: input, shape index: {}]   ;;  %s3156_s4 = inlined_call_operand.hbm [shape: f32[1,32], index: 4, kind: input, shape index: {}]   ;;  %s3157_s5 = inlined_call_operand.hbm [shape: bf16[32,128], index: 5, kind: input, shape index: {}]   ;;  %s3158_s6 = inlined_call_operand.hbm [shape: f32[1,128], index: 6, kind: input, shape index: {}]   ;;  %s3159_s7 = inlined_call_operand.hbm [shape: bf16[2,64,128], index: 7, kind: output, shape index: {}]  }
   0x1   :  { %14 = vsyncpa [#allocation4 + $0x1], 0 }
   0x2   :  { %15 = vsyncpa [#allocation7], 0 }
   0x3   :  { %16 = vsyncpa [#allocation10], 0 }
   0x4   :  { %17 = vsyncpa [#allocation13], 0 }
   0x5   :  { %18 = vsyncpa [#allocation5], 0 }
   0x6   :  { %20 = vsyncpa [#allocation5 + $0x1], 0  ;;  %s2484_s24 = smov 0   ;;  %s2486_s25 = smov 0  }
   0x7   :  { %s2488_s26 = smov 0   ;;  %s2490_s27 = smov 0  }
   0x8 LB: > { %s2429_s28 = smov [#allocation6]   ;;  %s2505_s30 = sadd.s32 4294967295, %s2427_s27   ;;  %s2427_s27 = sphi %s2490_s27, %s3195_s27   ;;  %s2423_s26 = sphi %s2488_s26, %s3194_s26   ;;  %s2419_s25 = sphi %s2486_s25, %s3193_s25   ;;  %s2415_s24 = sphi %s2484_s24, %s3192_s24  }
   0x9   : > { %s221_s29 = sshll.u32 %s2429_s28, 4  ;;  %p1691_p0 = scmp.ge.s32.totalorder %s2427_s27, 1  ;;  %s2510_s29 = int_to_ptr.vmem [resolvable:$true] %s221_s29 }
   0xa   : > { %p3160_p1 = scmp.eq.s32.totalorder %s2505_s30, 0  ;;  %p209_p2 = scmp.lt.s32.totalorder %s2427_s27, 3 }
   0xb   : > { %s2430_s9 = smov [#allocation9]   ;;  %s2431_s12 = smov [#allocation12]  }
   0xc   : > { %p2512_p3 = pnand %p1691_p0, %p209_p2  ;;  %s245_s10 = sshll.u32 %s2430_s9, 4  ;;  %s2525_s10 = int_to_ptr.vmem [resolvable:$true] %s245_s10 }
   0xd   : > { %s269_s13 = sshll.u32 %s2431_s12, 4  ;;  %s2151_s16 = scalar_lea.hbm %s3153_s1, 1024  ;;  %s2527_s13 = int_to_ptr.vmem [resolvable:$true] %s269_s13 }
   0xe   : > { %s3164_s8 = scalar_select %p2512_p3, 1, 0 }
   0xf   : > { %p2033_p5 = pneg %p2512_p3  ;;  %p2152_p7 = scmp.ne.s32.totalorder %s3153_s1, %s2151_s16 }
  0x10   : > { %p2158_p11 = scmp.lt.u32.totalorder %s2151_s16, %s3153_s1 }
  0x11   : > { %p2521_p6 = pnand %p2033_p5, %p3160_p1 }
  0x13   : > { %p2537_p8 = pneg %p2521_p6 }
  0x15   : > { %p2154_p9 = pnand %p2537_p8, %p2152_p7 }
  0x17   : > { %p2155_p10 = pneg %p2154_p9 }
  0x19   : > { %p2160_p12 = pnand %p2158_p11, %p2155_p10 }
  0x1b   : > { %2163 = shalt.err (!%p2160_p12)
}
  0x1c   : > { %s2164_s22 = scalar_lea.vmem %s2510_s29, 1024  ;;  %p2172_p5 = scmp.lt.s32.totalorder %s2510_s29, %s2510_s29 }
  0x1d   : > { %p2165_p13 = scmp.ne.s32.totalorder %s2510_s29, %s2164_s22  ;;  %p2173_p4 = scmp.lt.s32.totalorder %s2164_s22, %s2164_s22 }
  0x1f   : > { %p2167_p0 = pnand %p2165_p13, %p2537_p8  ;;  %p2174_p7 = por %p2173_p4, %p2172_p5 }
  0x21   : > { %p2168_p2 = pneg %p2167_p0 }
  0x23   : > { %p2175_p9 = pnand %p2174_p7, %p2168_p2 }
  0x25   : > { %2178 = shalt.err (!%p2175_p9)
}
  0x26   : > { %s3162_s23 = smov 64   ;;  %s2433_s28 = smov 4  }
  0x27   : > { %2036 = dma.hbm_to_vmem [thread:$0]  (!%p2521_p6), %s3153_s1, 1024, %s2510_s29, [#allocation7], %s3162_s23, %s3162_s23, %s2433_s28  }
  0x28   : > { %s2179_s16 = scalar_lea.hbm %s3155_s3, 2304 }
  0x29   : > { %p2180_p4 = scmp.ne.s32.totalorder %s3155_s3, %s2179_s16  ;;  %p2186_p12 = scmp.lt.u32.totalorder %s2179_s16, %s3155_s3 }
  0x2b   : > { %p2182_p10 = pnand %p2180_p4, %p2537_p8 }
  0x2d   : > { %p2183_p11 = pneg %p2182_p10 }
  0x2f   : > { %p2188_p13 = pnand %p2186_p12, %p2183_p11 }
  0x31   : > { %2191 = shalt.err (!%p2188_p13)
}
  0x32   : > { %s2192_s29 = scalar_lea.vmem %s2525_s10, 2304  ;;  %p2200_p7 = scmp.lt.s32.totalorder %s2525_s10, %s2525_s10 }
  0x33   : > { %p2193_p0 = scmp.ne.s32.totalorder %s2525_s10, %s2192_s29  ;;  %p2201_p9 = scmp.lt.s32.totalorder %s2192_s29, %s2192_s29 }
  0x35   : > { %p2195_p2 = pnand %p2193_p0, %p2537_p8  ;;  %p2202_p4 = por %p2201_p9, %p2200_p7 }
  0x37   : > { %p2196_p5 = pneg %p2195_p2 }
  0x39   : > { %p2203_p10 = pnand %p2202_p4, %p2196_p5 }
  0x3b   : > { %2206 = shalt.err (!%p2203_p10)
}
  0x3c   : > { %2042 = dma.hbm_to_vmem [thread:$0]  (!%p2521_p6), %s3155_s3, 2304, %s2525_s10, [#allocation10], %s3162_s23, %s3162_s23, %s2433_s28  }
  0x3d   : > { %s2207_s15 = scalar_lea.hbm %s3157_s5, 256 }
  0x3e   : > { %p2208_p11 = scmp.ne.s32.totalorder %s3157_s5, %s2207_s15  ;;  %p2214_p0 = scmp.lt.u32.totalorder %s2207_s15, %s3157_s5 }
  0x40   : > { %p2210_p12 = pnand %p2208_p11, %p2537_p8 }
  0x42   : > { %p2211_p13 = pneg %p2210_p12 }
  0x44   : > { %p2216_p2 = pnand %p2214_p0, %p2211_p13 }
  0x46   : > { %2219 = shalt.err (!%p2216_p2)
}
  0x47   : > { %s2220_s10 = scalar_lea.vmem %s2527_s13, 256  ;;  %p2228_p4 = scmp.lt.s32.totalorder %s2527_s13, %s2527_s13 }
  0x48   : > { %p2221_p5 = scmp.ne.s32.totalorder %s2527_s13, %s2220_s10  ;;  %p2229_p10 = scmp.lt.s32.totalorder %s2220_s10, %s2220_s10 }
  0x4a   : > { %p2223_p7 = pnand %p2221_p5, %p2537_p8  ;;  %p2230_p11 = por %p2229_p10, %p2228_p4 }
  0x4c   : > { %p2224_p9 = pneg %p2223_p7 }
  0x4e   : > { %p2231_p12 = pnand %p2230_p11, %p2224_p9 }
  0x50   : > { %2234 = shalt.err (!%p2231_p12)
}
  0x51   : > { %2048 = dma.hbm_to_vmem [thread:$0]  (!%p2521_p6), %s3157_s5, 256, %s2527_s13, [#allocation13], %s3162_s23, %s3162_s23, %s2433_s28  }
  0x52   : > { %s2434_s22 = smov [#allocation8]   ;;  %s2435_s12 = smov [#allocation11]  }
  0x53   : > { %s235_s9 = sshll.u32 %s2434_s22, 4  ;;  %s259_s14 = sshll.u32 %s2435_s12, 4  ;;  %s236_s9 = int_to_ptr.vmem [resolvable:$true] %s235_s9  ;;  %s260_s14 = int_to_ptr.vmem [resolvable:$true] %s259_s14 }
  0x54   : > { %s2235_s17 = scalar_lea.hbm %s3154_s2, 16 }
  0x55   : > { %p2236_p13 = scmp.ne.s32.totalorder %s3154_s2, %s2235_s17  ;;  %p2242_p5 = scmp.lt.u32.totalorder %s2235_s17, %s3154_s2 }
  0x57   : > { %p2238_p0 = pnand %p2236_p13, %p2537_p8 }
  0x59   : > { %p2239_p2 = pneg %p2238_p0 }
  0x5b   : > { %p2244_p7 = pnand %p2242_p5, %p2239_p2 }
  0x5d   : > { %2247 = shalt.err (!%p2244_p7)
}
  0x5e   : > { %s2248_s13 = scalar_lea.vmem %s236_s9, 16  ;;  %s2255_s29 = scalar_lea.vmem %s236_s9, 32 }
  0x5f   : > { %p2249_p9 = scmp.ne.s32.totalorder %s236_s9, %s2248_s13  ;;  %p2256_p11 = scmp.lt.s32.totalorder %s236_s9, %s236_s9 }
  0x60   : > { %p2257_p12 = scmp.lt.s32.totalorder %s2255_s29, %s2248_s13 }
  0x61   : > { %p2251_p4 = pnand %p2249_p9, %p2537_p8 }
  0x62   : > { %p2258_p1 = por %p2257_p12, %p2256_p11 }
  0x63   : > { %p2252_p10 = pneg %p2251_p4 }
  0x65   : > { %p2259_p3 = pnand %p2258_p1, %p2252_p10 }
  0x67   : > { %2262 = shalt.err (!%p2259_p3)
}
  0x68   : > { %2039 = dma.hbm_to_vmem [thread:$0]  (!%p2521_p6), %s3154_s2, 16, %s236_s9, [#allocation7]  }
  0x69   : > { %s2263_s17 = scalar_lea.hbm %s3156_s4, 16 }
  0x6a   : > { %p2264_p13 = scmp.ne.s32.totalorder %s3156_s4, %s2263_s17  ;;  %p2270_p3 = scmp.lt.u32.totalorder %s2263_s17, %s3156_s4 }
  0x6c   : > { %p2266_p0 = pnand %p2264_p13, %p2537_p8 }
  0x6e   : > { %p2267_p1 = pneg %p2266_p0 }
  0x70   : > { %p2272_p2 = pnand %p2270_p3, %p2267_p1 }
  0x72   : > { %2275 = shalt.err (!%p2272_p2)
}
  0x73   : > { %s2276_s13 = scalar_lea.vmem %s260_s14, 16  ;;  %s2283_s9 = scalar_lea.vmem %s260_s14, 32 }
  0x74   : > { %p2277_p5 = scmp.ne.s32.totalorder %s260_s14, %s2276_s13  ;;  %p2284_p4 = scmp.lt.s32.totalorder %s260_s14, %s260_s14 }
  0x75   : > { %p2285_p10 = scmp.lt.s32.totalorder %s2283_s9, %s2276_s13 }
  0x76   : > { %p2279_p7 = pnand %p2277_p5, %p2537_p8 }
  0x77   : > { %p2286_p11 = por %p2285_p10, %p2284_p4 }
  0x78   : > { %p2280_p9 = pneg %p2279_p7 }
  0x7a   : > { %p2287_p12 = pnand %p2286_p11, %p2280_p9 }
  0x7c   : > { %2290 = shalt.err (!%p2287_p12)
}
  0x7d   : > { %2045 = dma.hbm_to_vmem [thread:$0]  (!%p2521_p6), %s3156_s4, 16, %s260_s14, [#allocation10]  }
  0x7e   : > { %s2436_s12 = smov [#allocation14]   ;;  %s2291_s18 = scalar_lea.hbm %s3158_s6, 16 }
  0x7f   : > { %s283_s15 = sshll.u32 %s2436_s12, 4  ;;  %p2292_p13 = scmp.ne.s32.totalorder %s3158_s6, %s2291_s18  ;;  %s284_s15 = int_to_ptr.vmem [resolvable:$true] %s283_s15 }
  0x80   : > { %p2298_p3 = scmp.lt.u32.totalorder %s2291_s18, %s3158_s6 }
  0x81   : > { %p2294_p0 = pnand %p2292_p13, %p2537_p8 }
  0x83   : > { %p2295_p1 = pneg %p2294_p0 }
  0x85   : > { %p2300_p2 = pnand %p2298_p3, %p2295_p1 }
  0x87   : > { %2303 = shalt.err (!%p2300_p2)
}
  0x88   : > { %s2304_s14 = scalar_lea.vmem %s284_s15, 16  ;;  %s2311_s9 = scalar_lea.vmem %s284_s15, 32 }
  0x89   : > { %p2305_p5 = scmp.ne.s32.totalorder %s284_s15, %s2304_s14  ;;  %p2312_p4 = scmp.lt.s32.totalorder %s284_s15, %s284_s15 }
  0x8a   : > { %p2313_p10 = scmp.lt.s32.totalorder %s2311_s9, %s2304_s14 }
  0x8b   : > { %p2307_p7 = pnand %p2305_p5, %p2537_p8 }
  0x8c   : > { %p2314_p11 = por %p2313_p10, %p2312_p4 }
  0x8d   : > { %p2308_p9 = pneg %p2307_p7 }
  0x8f   : > { %p2315_p12 = pnand %p2314_p11, %p2308_p9 }
  0x91   : > { %2318 = shalt.err (!%p2315_p12)
}
  0x92   : > { %2051 = dma.hbm_to_vmem [thread:$0]  (!%p2521_p6), %s3158_s6, 16, %s284_s15, [#allocation13]  }
  0x93   : > { %s1690_s19 = sadd.s32 4294967294, %s2427_s27   ;;  %s2669_s11 = sadd.s32 1, %s2427_s27  }
  0x94   : > { %s30_s12 = ssub.s32 %s2427_s27, %s2669_s11  ;;  %s33_s16 = sadd.s32 1, %s2423_s26 }
  0x95   : > { %p31_p8 = scmp.eq.s32.totalorder %s30_s12, 0  ;;  %p40_p13 = scmp.ne.s32.totalorder %s2423_s26, %s2419_s25 }
  0x96   : > { %p41_p0 = scmp.eq.s32.totalorder %s2427_s27, 0  ;;  %p46_p1 = scmp.ne.s32.totalorder %s2419_s25, %s2415_s24 }
  0x97   : > { %s2680_s17 = scalar_select %p31_p8, %s2423_s26, %s33_s16  }
  0x98   : > { %p2682_p3 = por %p41_p0, %p40_p13  ;;  %p3168_p2 = scmp.eq.s32.totalorder %s2505_s30, 0 }
  0x99   : > { %p196_p5 = scmp.eq.s32.totalorder %s2505_s30, 1  ;;  %p202_p7 = scmp.eq.s32.totalorder %s1690_s19, 1 }
  0x9a   : > { %p2688_p6 = por %p3168_p2, %p46_p1  ;;  %p2066_p9 = scmp.lt.s32.totalorder %s2427_s27, 2 }
  0x9b   : > { %s294_s20 = sand.u32 1, %s2423_s26   ;;  %p2695_p4 = por %p196_p5, %p40_p13 }
  0x9c   : > { %p2699_p10 = por %p202_p7, %p46_p1  ;;  %s1699_s13 = sshll.u32 %s294_s20, 5 }
  0x9d   : > { %s3170_s10 = scalar_select %p2695_p4, 1, 0 }
  0x9e   : > { %s3171_s21 = scalar_select %p2699_p10, 1, 0 }
  0x9f   : > { %s1829_s14 = sshll.u32 %s2427_s27, 9  ;;  %s298_s19 = scalar_lea.vmem [#allocation3], %s1699_s13 }
  0xa0   : > { %s2707_s22 = scalar_lea.hbm %s3152_s0, %s1829_s14  ;;  %s305_s12 = sshll.u32 %s298_s19, 4  ;;  %s2709_s12 = int_to_ptr.vmem [resolvable:$true] %s305_s12 }
  0xa1   : > { %p2713_p11 = pnand %p2066_p9, %p2682_p3  ;;  %s2717_s23 = scalar_lea.sflag [#allocation4], %s294_s20 }
  0xa2   : > { %s2319_s9 = scalar_lea.hbm %s2707_s22, 512  ;;  %s2324_s18 = scalar_lea.hbm %s3152_s0, 1024 }
  0xa3   : > { %p2320_p12 = scmp.ne.s32.totalorder %s2707_s22, %s2319_s9  ;;  %p2321_p8 = pneg %p2713_p11 }
  0xa4   : > { %p2325_p1 = scmp.lt.u32.totalorder %s2707_s22, %s3152_s0  ;;  %p2326_p3 = scmp.lt.u32.totalorder %s2324_s18, %s2319_s9 }
  0xa5   : > { %p2322_p13 = pnand %p2321_p8, %p2320_p12  ;;  %p2328_p5 = scmp.lt.u32.totalorder %s2319_s9, %s2707_s22 }
  0xa6   : > { %p2327_p2 = por %p2326_p3, %p2325_p1 }
  0xa7   : > { %p2323_p0 = pneg %p2322_p13 }
  0xa8   : > { %p2329_p7 = por %p2328_p5, %p2327_p2 }
  0xaa   : > { %p2330_p9 = pnand %p2329_p7, %p2323_p0 }
  0xac   : > { %2333 = shalt.err (!%p2330_p9)
}
  0xad   : > { %s2334_s20 = scalar_lea.vmem %s2709_s12, 512  ;;  %s2437_s13 = smov [#allocation3]  }
  0xae   : > { %p2335_p12 = scmp.ne.s32.totalorder %s2709_s12, %s2334_s20  ;;  %s2339_s14 = sshll.u32 %s2437_s13, 4  ;;  %s2340_s14 = int_to_ptr.vmem [resolvable:$false] %s2339_s14 }
  0xaf   : > { %s2341_s29 = scalar_lea.vmem %s2340_s14, 1024  ;;  %p2342_p4 = scmp.lt.s32.totalorder %s2709_s12, %s2340_s14 }
  0xb0   : > { %p2337_p13 = pnand %p2335_p12, %p2321_p8  ;;  %p2343_p1 = scmp.lt.s32.totalorder %s2341_s29, %s2334_s20 }
  0xb2   : > { %p2338_p10 = pneg %p2337_p13  ;;  %p2344_p3 = por %p2343_p1, %p2342_p4 }
  0xb4   : > { %p2345_p2 = pnand %p2344_p3, %p2338_p10 }
  0xb6   : > { %2348 = shalt.err (!%p2345_p2)
}
  0xb7   : > { %s3173_s9 = smov 64   ;;  %p3174_p8 = scmp.ne.s32.totalorder %s3164_s8, 0 }
  0xb8   : > { %2055 = dma.hbm_to_vmem [thread:$0]  (!%p2713_p11), %s2707_s22, 512, %s2709_s12, %s2717_s23, %s3173_s9, %s3173_s9, %s2433_s28  }
  0xb9   : > { %317 = sbr.rel (%p3174_p8) target bundleno = 1114 (0x45a), region = 48  ;;  %s2751_s18 = sand.u32 (!%p3174_p8), 1, %s2419_s25  }
  0xba   : > { %s1703_s19 = sshll.u32 (!%p3174_p8), %s2751_s18, 5  ;;  %s320_s20 = scalar_lea.sflag (!%p3174_p8), [#allocation4], %s2751_s18 }
  0xbb   : > { %s2757_s16 = scalar_lea.vmem (!%p3174_p8), [#allocation3], %s1703_s19 }
  0xc0   : > { %2394 = dma.done.wait (%p2688_p6), %s320_s20, 512  }
  0xc1   : > { %2396 = vsyncadd (%p2688_p6), %s320_s20, 4294966784  ;;  %p3175_p4 = scmp.eq.s32.totalorder %s2505_s30, 0 }
  0xc3   : > { %2398 = dma.done.wait (%p3175_p4), [#allocation7], 1040   ;;  %p3176_p10 = pmov %p3175_p4 }
  0xc4   : > { %p3177_p11 = pmov %p3175_p4 }
  0xc5   : > { %2400 = vsyncadd (%p3176_p10), [#allocation7], 4294966256 }
  0xc6   : > { %2402 = dma.done.wait (%p3177_p11), [#allocation10], 2320   ;;  %p3178_p0 = pmov %p3175_p4 }
  0xc8   : > { %2404 = vsyncadd (%p3178_p0), [#allocation10], 4294964976  ;;  %p3179_p5 = pmov %p3178_p0 }
  0xc9   : > { %p3180_p7 = pmov %p3178_p0 }
  0xca   : > { %2406 = dma.done.wait (%p3179_p5), [#allocation13], 272  }
  0xcb   : > { %2408 = vsyncadd (%p3180_p7), [#allocation13], 4294967024  ;;  %v2119_v0 = vld [vmem:[#allocation6] sm:$0xff]   ;;  %v2120_v1 = vld [vmem:[#allocation6 + $0x8] sm:$0xff]   ;;  %vm651_vm0 = vcmask 1040384   ;;  %v2438_v14 = vmov 0  }
  0xcc   : > { %1953 = vmatprep.subr.bf16.mxu0 %v2119_v0  ;;  %v2121_v2 = vld [vmem:[#allocation6 + $0x10] sm:$0xff]   ;;  %v2122_v3 = vld [vmem:[#allocation6 + $0x18] sm:$0xff]   ;;  %v2127_v4 = vld [vmem:[%s2757_s16] sm:$0xff]   ;;  %vm652_vm1 = vsmask.f32 256  ;;  %v582_v15 = vrot.slane %v2438_v14, 7 }
  0xcd   : > { %1954 = vmatpush3.bf16.msra.mxu0 %v2119_v0  ;;  %1969 = vmatprep.mubr.bf16.mxu0 %v2127_v4  ;;  %v2123_v5 = vld [vmem:[#allocation6 + $0x20] sm:$0xff]   ;;  %v2124_v6 = vld [vmem:[#allocation6 + $0x28] sm:$0xff]   ;;  %v2125_v7 = vld [vmem:[#allocation6 + $0x30] sm:$0xff]   ;;  %vm663_vm3 = vcmask 1044480   ;;  %vm664_vm4 = vsmask.f32 4352 }
  0xce   : > { %1955 = vmatprep.subr.bf16.mxu0 %v2120_v1  ;;  %v2126_v8 = vld [vmem:[#allocation6 + $0x38] sm:$0xff]   ;;  %v2128_v9 = vld [vmem:[%s2757_s16 + $0x8] sm:$0xff]   ;;  %v2129_v10 = vld [vmem:[%s2757_s16 + $0x10] sm:$0xff]   ;;  %vm872_vm6 = vcmask 1042432   ;;  %vm873_vm7 = vcmask 1046532   ;;  %vm699_vm12 = vcmask 261120  }
  0xcf   : > { %v2130_v11 = vld [vmem:[%s2757_s16 + $0x18] sm:$0xff]   ;;  %v2779_v12 = vld [vmem:[#allocation9 + $0x80] sm:$0xff]   ;;  %v2783_v13 = vld [vmem:[#allocation9 + $0x88] sm:$0xff]   ;;  %vm728_vm8 = vsmask.f32 3328  ;;  %s2439_s8 = smov 96  }
  0xd0   : > { %vm2787_vm2 = vmand %vm651_vm0, %vm652_vm1  ;;  %v1711_v26 = vld [vmem:[#allocation8] ss:$0 sm:$0xff]  ;;  %vm729_vm9 = vsmask.f32 7440  ;;  %v2133_v53 = vld [vmem:[#allocation9 + $0x40] sm:$0xff]   ;;  %s2440_s23 = smov 64  }
  0xd1   : > { %1956 = vmatpush3.bf16.msra.mxu0 %v2120_v1  ;;  %vm2791_vm5 = vmand %vm663_vm3, %vm664_vm4  ;;  %v654_v18 = vsel %vm2787_vm2, 0, %v582_v15  ;;  %v2134_v54 = vld [vmem:[#allocation9] sm:$0xff]   ;;  %1901 = vmatprep.subr.bf16.mxu1 %v2133_v53  ;;  %s2441_s28 = smov 32   ;;  %vm867_vm13 = vcmask 523520   ;;  %vm931_vm14 = vcmask 785920   ;;  %vm954_vm15 = vcmask 1048320  }
  0xd2   : > { %1957 = vmatprep.subr.bf16.mxu0 %v2121_v2  ;;  %v2799_v19 = vsel %vm2791_vm5, %v654_v18, 0  ;;  %vm2805_vm10 = vmor %vm872_vm6, %vm873_vm7  ;;  %1902 = vmatpush3.bf16.msra.mxu1 %v2134_v54  ;;  %s3091_s15 = scalar_lea.vmem [#allocation15], %s1703_s19  ;;  %s1846_s12 = sshll.u32 %s2505_s30, 9 }
  0xd3   : > { %v1736_v20 = vcombine.low %v2799_v19, %v2799_v19  ;;  %v1737_v25 = vcombine.high %v2799_v19, %v2799_v19  ;;  %vm2809_vm11 = vmor %vm728_vm8, %vm729_vm9  ;;  %s1560_s22 = sshll.u32 %s3091_s15, 4  ;;  %s3104_s29 = scalar_lea.hbm %s3159_s7, %s1846_s12  ;;  %s3099_s22 = int_to_ptr.vmem [resolvable:$true] %s1560_s22 }
  0xd4   : > { %s1547_s9 = scalar_lea.sflag [#allocation5], %s2751_s18  ;;  %s2349_s19 = scalar_lea.vmem %s3099_s22, 512 }
  0xd5   : > { %1958 = vmatpush3.bf16.msra.mxu0 %v2121_v2  ;;  %v732_v21 = vshrl.u32 %v1736_v20, 16  ;;  %v735_v22 = vshll.u32 %v1736_v20, 16  ;;  %v741_v28 = vshll.u32 %v1737_v25, 16  ;;  %v1756_v34 = vrot.slane %v1736_v20, 9  ;;  %p2350_p6 = scmp.ne.s32.totalorder %s3099_s22, %s2349_s19  ;;  %p3189_p9 = scmp.ne.s32.totalorder %s3170_s10, 0 }
  0xd6   : > { %1959 = vmatprep.subr.bf16.mxu0 %v2122_v3  ;;  %v877_v35 = vrot.slane %v1737_v25, 5  ;;  %s2442_s30 = smov [#allocation15]  }
  0xd7   : > { %v734_v23 = vrot.slane %v732_v21, 4  ;;  %v737_v24 = vrot.slane %v735_v22, 5  ;;  %v743_v41 = vrot.slane %v741_v28, 5  ;;  %p2351_p12 = pnand %p2350_p6, %p3189_p9  ;;  %s2353_s20 = sshll.u32 %s2442_s30, 4  ;;  %s2354_s20 = int_to_ptr.vmem [resolvable:$false] %s2353_s20 }
  0xd8   : > { %v2815_v51 = vsel %vm2805_vm10, %v1756_v34, %v877_v35  ;;  %p2356_p1 = scmp.lt.s32.totalorder %s3099_s22, %s2354_s20 }
  0xd9   : > { %1960 = vmatpush3.bf16.msra.mxu0 %v2122_v3  ;;  %v738_v27 = vor.u32 %v737_v24, %v734_v23  ;;  %p2352_p13 = pneg %p2351_p12 }
  0xda   : > { %1961 = vmatprep.subr.bf16.mxu0 %v2123_v5 }
  0xdb   : > { %v739_v40 = vrot.slane %v738_v27, 4 }
  0xdd   : > { %1962 = vmatpush3.bf16.msra.mxu0 %v2123_v5  ;;  %v2819_v52 = vsel %vm2809_vm11, %v739_v40, %v743_v41  ;;  %v2135_v41 = vld [vmem:[#allocation9 + $0x48] sm:$0xff]  }
  0xde   : > { %1963 = vmatprep.subr.bf16.mxu0 %v2124_v6  ;;  %1903 = vmatprep.subr.bf16.mxu1 %v2135_v41 }
  0xe1   : > { %1964 = vmatpush3.bf16.msra.mxu0 %v2124_v6 }
  0xe2   : > { %1965 = vmatprep.subr.bf16.mxu0 %v2125_v7 }
  0xe5   : > { %1966 = vmatpush3.bf16.msra.mxu0 %v2125_v7 }
  0xe6   : > { %1967 = vmatprep.subr.bf16.mxu0 %v2126_v8 }
  0xe9   : > { %1968 = vmatpush3.bf16.msra.mxu0 %v2126_v8 }
  0xea   : > { %1977 = vmatprep.subr.bf16.mxu0 %v2779_v12 }
  0xec   : > { %1970 = vmatmul.mubr.bf16.vlgmr.msra.gmra.mrb[0].mxu0 %v2128_v9 }
  0xed   : > { %1973 = vmatprep.mubr.bf16.mxu0 %v2129_v10  ;;  %1978 = vmatpush3.bf16.msra.mxu0 %v2779_v12 }
  0xee   : > { %1979 = vmatprep.subr.bf16.mxu0 %v2783_v13 }
  0xf1   : > { %1980 = vmatpush3.bf16.msra.mxu0 %v2783_v13 }
  0xf4   : > { %1974 = vmatmul.mubr.bf16.gmra.mrb[4].mxu0 %v2130_v11 }
 0x1bf   : > { %v1971_v29 = vpop.f32.mrb[0].mxu0 }
 0x1c0   : > { %v525_v30 = vadd.f32 %v1971_v29, %v1711_v26  ;;  %v516_v31 = vpop.f32.mrb[1].mxu0 }
 0x1c1   : > { %v517_v32 = vadd.f32 %v1711_v26, %v516_v31  ;;  %v1972_v33 = vpop.f32.mrb[2].mxu0 }
 0x1c2   : > { %v549_v36 = vmax.f32 %v525_v30, 0.0  ;;  %v528_v37 = vadd.f32 %v1972_v33, %v1711_v26  ;;  %v519_v38 = vpop.f32.mrb[3].mxu0 }
 0x1c3   : > { %v547_v42 = vmax.f32 %v517_v32, 0.0  ;;  %v520_v43 = vadd.f32 %v1711_v26, %v519_v38 }
 0x1c4   : > { %v1832_v45 = vpack.c.bf16 %v549_v36, %v549_v36  ;;  %v550_v46 = vmax.f32 %v528_v37, 0.0 }
 0x1c5   : > { %v1830_v47 = vpack.c.bf16 %v547_v42, %v547_v42  ;;  %v548_v48 = vmax.f32 %v520_v43, 0.0  ;;  %v2136_v42 = vld [vmem:[#allocation9 + $0x8] sm:$0xff]  }
 0x1c6   : > { %v601_v49 = vshrl.u32 %v1832_v45, 16  ;;  %v1833_v50 = vpack.c.bf16 %v550_v46, %v550_v46  ;;  %v604_v55 = vshll.u32 %v1832_v45, 16  ;;  %1904 = vmatpush3.bf16.msra.mxu1 %v2136_v42 }
 0x1c7   : > { %v587_v56 = vshrl.u32 %v1830_v47, 16  ;;  %v590_v57 = vshll.u32 %v1830_v47, 16  ;;  %v1831_v58 = vpack.c.bf16 %v548_v48, %v548_v48  ;;  %v1975_v59 = vpop.f32.mrb[4].mxu0 }
 0x1c8   : > { %v603_v60 = vrot.slane %v601_v49, 7  ;;  %v608_v61 = vshrl.u32 %v1833_v50, 16  ;;  %v611_v62 = vshll.u32 %v1833_v50, 16  ;;  %v541_v63 = vadd.f32 %v1975_v59, %v1711_v26  ;;  %v532_v0 = vpop.f32.mrb[5].mxu0 }
 0x1c9   : > { %v589_v1 = vrot.slane %v587_v56, 7  ;;  %v594_v2 = vshrl.u32 %v1831_v58, 16  ;;  %v597_v3 = vshll.u32 %v1831_v58, 16  ;;  %v533_v4 = vadd.f32 %v1711_v26, %v532_v0  ;;  %v1976_v5 = vpop.f32.mrb[6].mxu0 }
 0x1ca   : > { %v606_v6 = vor.u32 %v604_v55, %v603_v60  ;;  %v610_v7 = vrot.slane %v608_v61, 7  ;;  %v553_v8 = vmax.f32 %v541_v63, 0.0  ;;  %v544_v9 = vadd.f32 %v1976_v5, %v1711_v26  ;;  %v535_v10 = vpop.f32.mrb[7].mxu0 }
 0x1cb   : > { %v2821_v11 = vor.u32 %v590_v57, %v589_v1  ;;  %v596_v14 = vrot.slane %v594_v2, 7  ;;  %v551_v15 = vmax.f32 %v533_v4, 0.0  ;;  %v536_v18 = vadd.f32 %v1711_v26, %v535_v10  ;;  %v2137_v2 = vld [vmem:[#allocation9 + $0x50] sm:$0xff]  }
 0x1cc   : > { %v613_v20 = vor.u32 %v611_v62, %v610_v7  ;;  %v1836_v21 = vpack.c.bf16 %v553_v8, %v553_v8  ;;  %v554_v22 = vmax.f32 %v544_v9, 0.0  ;;  %v657_v23 = vsel %vm2787_vm2, 0, %v606_v6  ;;  %1905 = vmatprep.subr.bf16.mxu1 %v2137_v2 }
 0x1cd   : > { %v655_v24 = vsel %vm2787_vm2, 0, %v2821_v11  ;;  %v599_v25 = vor.u32 %v597_v3, %v596_v14  ;;  %v1834_v27 = vpack.c.bf16 %v551_v15, %v551_v15  ;;  %v552_v28 = vmax.f32 %v536_v18, 0.0  ;;  %v2138_v3 = vld [vmem:[#allocation9 + $0x10] sm:$0xff]  }
 0x1ce   : > { %v629_v29 = vshrl.u32 %v1836_v21, 16  ;;  %v632_v30 = vshll.u32 %v1836_v21, 16  ;;  %v1837_v31 = vpack.c.bf16 %v554_v22, %v554_v22  ;;  %v658_v26 = vsel %vm2787_vm2, 0, %v613_v20  ;;  %1906 = vmatpush3.bf16.msra.mxu1 %v2138_v3 }
 0x1cf   : > { %v656_v32 = vsel %vm2787_vm2, 0, %v599_v25  ;;  %v615_v33 = vshrl.u32 %v1834_v27, 16  ;;  %v618_v34 = vshll.u32 %v1834_v27, 16  ;;  %v1835_v35 = vpack.c.bf16 %v552_v28, %v552_v28  ;;  %v2139_v28 = vld [vmem:[#allocation9 + $0x58] sm:$0xff]  }
 0x1d0   : > { %v631_v36 = vrot.slane %v629_v29, 7  ;;  %v636_v37 = vshrl.u32 %v1837_v31, 16  ;;  %v639_v38 = vshll.u32 %v1837_v31, 16  ;;  %v669_v40 = vsel %vm2791_vm5, %v657_v23, 0  ;;  %v2140_v29 = vld [vmem:[#allocation9 + $0x18] sm:$0xff]   ;;  %1907 = vmatprep.subr.bf16.mxu1 %v2139_v28 }
 0x1d1   : > { %v617_v43 = vrot.slane %v615_v33, 7  ;;  %v622_v45 = vshrl.u32 %v1835_v35, 16  ;;  %v625_v46 = vshll.u32 %v1835_v35, 16  ;;  %v670_v47 = vsel %vm2791_vm5, %v658_v26, 0 }
 0x1d2   : > { %v634_v48 = vor.u32 %v632_v30, %v631_v36  ;;  %v638_v49 = vrot.slane %v636_v37, 7  ;;  %v2836_v50 = vcombine.low %v669_v40, %v669_v40  ;;  %v1769_v53 = vcombine.low %v669_v40, %v670_v47  ;;  %1908 = vmatpush3.bf16.msra.mxu1 %v2140_v29 }
 0x1d3   : > { %v620_v54 = vor.u32 %v618_v34, %v617_v43  ;;  %v624_v55 = vrot.slane %v622_v45, 7  ;;  %v2838_v56 = vcombine.low %v670_v47, %v670_v47  ;;  %v668_v57 = vsel %vm2791_vm5, %v656_v32, 0 }
 0x1d4   : > { %v661_v58 = vsel %vm2787_vm2, 0, %v634_v48  ;;  %v641_v59 = vor.u32 %v639_v38, %v638_v49  ;;  %944 = vrot.lane.b32.xlu1 %v1769_v53, %s2439_s8  ;;  %v1733_v60 = vcombine.low %v668_v57, %v669_v40  ;;  %v2845_v61 = vcombine.low %v668_v57, %v668_v57  ;;  %v2141_v38 = vld [vmem:[#allocation9 + $0x60] sm:$0xff]  }
 0x1d5   : > { %v659_v62 = vsel %vm2787_vm2, 0, %v620_v54  ;;  %v627_v63 = vor.u32 %v625_v46, %v624_v55  ;;  %v2849_v0 = vcombine.high %v669_v40, %v669_v40  ;;  %v2851_v1 = vcombine.high %v670_v47, %v670_v47  ;;  %v2142_v40 = vld [vmem:[#allocation9 + $0x20] sm:$0xff]   ;;  %1909 = vmatprep.subr.bf16.mxu1 %v2141_v38 }
 0x1d6   : > { %v2855_v4 = vsel %vm2791_vm5, %v659_v62, 0  ;;  %v662_v5 = vsel %vm2787_vm2, 0, %v641_v59  ;;  %v1759_v6 = vrot.slane %v2836_v50, 9  ;;  %v1760_v7 = vrot.slane %v2838_v56, 9  ;;  %701 = vst.msk [vmem:[#allocation2 + $0x18] sm:$0xff] %vm699_vm12, %v1733_v60  ;;  %1910 = vmatpush3.bf16.msra.mxu1 %v2142_v40 }
 0x1d7   : > { %v2864_v8 = vcombine.low %v2855_v4, %v2855_v4  ;;  %v2868_v9 = vsel %vm2791_vm5, %v662_v5, 0  ;;  %v660_v10 = vsel %vm2787_vm2, 0, %v627_v63  ;;  %v889_v14 = vrot.slane %v2849_v0, 5 }
 0x1d8   : > { %v2875_v15 = vcombine.low %v2868_v9, %v2868_v9  ;;  %1015 = vrot.lane.b32.xlu1 %v1733_v60, %s2440_s23  ;;  %v893_v18 = vrot.slane %v2851_v1, 5  ;;  %v1741_v20 = vcombine.high %v668_v57, %v668_v57  ;;  %v2881_v21 = vcombine.high %v2855_v4, %v2855_v4 }
 0x1d9   : > { %v890_v22 = vsel %vm2805_vm10, %v1759_v6, %v889_v14  ;;  %v1758_v23 = vrot.slane %v2845_v61, 9  ;;  %v1761_v25 = vrot.slane %v2864_v8, 9  ;;  %v2893_v27 = vsel %vm2791_vm5, %v655_v24, 0 }
 0x1da   : > { %v894_v30 = vsel %vm2805_vm10, %v1760_v7, %v893_v18  ;;  %v885_v31 = vrot.slane %v1741_v20, 5  ;;  %v897_v26 = vrot.slane %v2881_v21, 5  ;;  %v1768_v32 = vcombine.low %v2893_v27, %v668_v57 }
 0x1db   : > { %v1780_v33 = vcombine.low %v890_v22, %v894_v30  ;;  %v1738_v16 = vcombine.low %v2893_v27, %v2893_v27  ;;  %v1739_v11 = vcombine.high %v2893_v27, %v2893_v27  ;;  %v1734_v24 = vcombine.low %v670_v47, %v2855_v4 }
 0x1dc   : > { %v886_v34 = vsel %vm2805_vm10, %v1758_v23, %v885_v31  ;;  %v2908_v35 = vsel %vm2805_vm10, %v1761_v25, %v897_v26  ;;  %942 = vrot.lane.b32.xlu1 %v1768_v32, %s2439_s8  ;;  %v2913_v36 = vsel %vm2791_vm5, %v660_v10, 0  ;;  %v2917_v37 = vsel %vm2791_vm5, %v661_v58, 0  ;;  %v2143_v23 = vld [vmem:[#allocation9 + $0x68] sm:$0xff]  }
 0x1dd   : > { %1000 = vrot.lane.b32.xlu0 %v1780_v33, %s2441_s28  ;;  %v1765_v41 = vcombine.low %v886_v34, %v890_v22  ;;  %v2921_v42 = vcombine.low %v894_v30, %v2908_v35  ;;  %v1757_v43 = vrot.slane %v1738_v16, 9  ;;  %v881_v45 = vrot.slane %v1739_v11, 5  ;;  %702 = vst.msk [vmem:[#allocation2 + $0x30] sm:$0xff] %vm699_vm12, %v1734_v24  ;;  %1911 = vmatprep.subr.bf16.mxu1 %v2143_v23  ;;  %v2145_v33 = vld [vmem:[#allocation9 + $0x70] sm:$0xff]  }
 0x1de   : > { %v2926_v46 = vcombine.low %v2913_v36, %v2917_v37  ;;  %v2930_v17 = vcombine.low %v2913_v36, %v2913_v36  ;;  %v2934_v47 = vcombine.low %v2917_v37, %v2917_v37  ;;  %v1770_v48 = vcombine.low %v2855_v4, %v2913_v36 }
 0x1df   : > { %1053 = vst.msk [vmem:[#allocation2 + $0x10] sm:$0xff] %vm699_vm12, %v1765_v41  ;;  %1054 = vst.msk [vmem:[#allocation2 + $0x28] sm:$0xff] %vm699_vm12, %v2921_v42  ;;  %v882_v49 = vsel %vm2805_vm10, %v1757_v43, %v881_v45  ;;  %v746_v53 = vshrl.u32 %v1738_v16, 16  ;;  %v749_v54 = vshll.u32 %v1738_v16, 16  ;;  %v755_v55 = vshll.u32 %v1739_v11, 16 }
 0x1e0   : > { %v1779_v57 = vcombine.low %v882_v49, %v886_v34  ;;  %v1764_v58 = vcombine.low %v2815_v51, %v882_v49  ;;  %703 = vst.msk [vmem:[#allocation2 + $0x48] sm:$0xff] %vm699_vm12, %v2926_v46  ;;  %v760_v59 = vshrl.u32 %v2845_v61, 16  ;;  %v763_v60 = vshll.u32 %v2845_v61, 16 }
 0x1e1   : > { %v748_v62 = vrot.slane %v746_v53, 4  ;;  %v751_v63 = vrot.slane %v749_v54, 5  ;;  %v757_v2 = vrot.slane %v755_v55, 5  ;;  %v769_v3 = vshll.u32 %v1741_v20, 16  ;;  %v2144_v20 = vld [vmem:[#allocation9 + $0x28] sm:$0xff]  }
 0x1e2   : > { %998 = vrot.lane.b32.xlu0 %v1779_v57, %s2441_s28  ;;  %919 = vrot.lane.b32.xlu1 %v1764_v58, %s2440_s23  ;;  %v762_v5 = vrot.slane %v760_v59, 4  ;;  %v765_v6 = vrot.slane %v763_v60, 5  ;;  %v774_v7 = vshrl.u32 %v2836_v50, 16  ;;  %v777_v10 = vshll.u32 %v2836_v50, 16 }
 0x1e3   : > { %v752_v14 = vor.u32 %v751_v63, %v748_v62  ;;  %v771_v18 = vrot.slane %v769_v3, 5  ;;  %v783_v22 = vshll.u32 %v2849_v0, 16  ;;  %v2955_v61 = vcombine.high %v2913_v36, %v2913_v36  ;;  %1912 = vmatpush3.bf16.msra.mxu1 %v2144_v20  ;;  %v2147_v3 = vld [vmem:[#allocation9 + $0x78] sm:$0xff]  }
 0x1e4   : > { %v766_v25 = vor.u32 %v765_v6, %v762_v5  ;;  %v776_v28 = vrot.slane %v774_v7, 4  ;;  %v779_v29 = vrot.slane %v777_v10, 5  ;;  %v1762_v30 = vrot.slane %v2930_v17, 9  ;;  %1913 = vmatprep.subr.bf16.mxu1 %v2145_v33  ;;  %v2148_v36 = vld [vmem:[#allocation9 + $0x38] sm:$0xff]  }
 0x1e5   : > { %v753_v31 = vrot.slane %v752_v14, 4  ;;  %v785_v26 = vrot.slane %v783_v22, 5  ;;  %v901_v32 = vrot.slane %v2955_v61, 5  ;;  %v788_v50 = vshrl.u32 %v2838_v56, 16 }
 0x1e6   : > { %1017 = vrot.lane.b32.xlu0 %v1734_v24, %s2440_s23  ;;  %v1059_v0 = vld [vmem:[#allocation2 + $0x10] sm:$0xff]  ;;  %921 = vrot.lane.b32.xlu1 %v1765_v41, %s2440_s23  ;;  %v1062_v16 = vld [vmem:[#allocation2 + $0x28] sm:$0xff]  ;;  %v767_v11 = vrot.slane %v766_v25, 4  ;;  %v780_v34 = vor.u32 %v779_v29, %v776_v28  ;;  %v791_v38 = vshll.u32 %v2838_v56, 16  ;;  %v797_v40 = vshll.u32 %v2851_v1, 16 }
 0x1e7   : > { %1981 = vmatprep.mubr.msk.bf16.mxu0 %vm699_vm12, %v1059_v0  ;;  %v758_v43 = vsel %vm2809_vm11, %v753_v31, %v757_v2  ;;  %v2969_v45 = vsel %vm2805_vm10, %v1762_v30, %v901_v32  ;;  %v790_v24 = vrot.slane %v788_v50, 4  ;;  %v802_v49 = vshrl.u32 %v2864_v8, 16  ;;  %v2146_v41 = vld [vmem:[#allocation9 + $0x30] sm:$0xff]  }
 0x1e8   : > { %1982 = vmatmul.mubr.msk.bf16.vlgmr.msra.gmra.mrb[8].mxu0 %vm699_vm12, %v1062_v16  ;;  %v1752_v56 = vcombine.low %v2819_v52, %v758_v43  ;;  %v772_v1 = vsel %vm2809_vm11, %v767_v11, %v771_v18  ;;  %v781_v53 = vrot.slane %v780_v34, 4  ;;  %v1781_v54 = vcombine.low %v2908_v35, %v2969_v45  ;;  %1914 = vmatpush3.bf16.msra.mxu1 %v2146_v41 }
 0x1e9   : > { %v1774_v55 = vcombine.low %v758_v43, %v772_v1  ;;  %v793_v57 = vrot.slane %v791_v38, 5  ;;  %v799_v58 = vrot.slane %v797_v40, 5  ;;  %v804_v59 = vrot.slane %v802_v49, 4  ;;  %1915 = vmatprep.subr.bf16.mxu1 %v2147_v3 }
 0x1ea   : > { %1019 = vrot.lane.b32.xlu0 %v2926_v46, %s2440_s23  ;;  %946 = vrot.lane.b32.xlu1 %v1770_v48, %s2439_s8  ;;  %v786_v60 = vsel %vm2809_vm11, %v781_v53, %v785_v26  ;;  %v805_v62 = vshll.u32 %v2864_v8, 16  ;;  %v811_v63 = vshll.u32 %v2881_v21, 16  ;;  %v1751_v2 = vcombine.high %v2917_v37, %v2917_v37 }
 0x1eb   : > { %v1753_v5 = vcombine.low %v772_v1, %v786_v60  ;;  %985 = vst.msk [vmem:[#allocation2 + $0x8] sm:$0xff] %vm699_vm12, %v1774_v55  ;;  %v794_v46 = vor.u32 %v793_v57, %v790_v24  ;;  %v1763_v6 = vrot.slane %v2934_v47, 9  ;;  %v2994_v4 = vcombine.high %v2868_v9, %v2868_v9 }
 0x1ec   : > { %v807_v48 = vrot.slane %v805_v62, 5  ;;  %v813_v8 = vrot.slane %v811_v63, 5  ;;  %v905_v7 = vrot.slane %v1751_v2, 5  ;;  %v1778_v21 = vrot.slane %v2875_v15, 9  ;;  %1916 = vmatpush3.bf16.msra.mxu1 %v2148_v36 }
 0x1ed   : > { %v795_v10 = vrot.slane %v794_v46, 4  ;;  %v991_v14 = vrot.slane %v2994_v4, 5  ;;  %v816_v18 = vshrl.u32 %v2930_v17, 16  ;;  %v819_v22 = vshll.u32 %v2930_v17, 16  ;;  %2001 = vmatprep.subr.bf16.mxu1 %v2779_v12 }
 0x1ee   : > { %855 = vrot.lane.b32.xlu0 %v1752_v56, %s2441_s28  ;;  %857 = vrot.lane.b32.xlu1 %v1753_v5, %s2441_s28  ;;  %v808_v23 = vor.u32 %v807_v48, %v804_v59  ;;  %v906_v20 = vsel %vm2805_vm10, %v1763_v6, %v905_v7  ;;  %v825_v25 = vshll.u32 %v2955_v61, 16  ;;  %v830_v28 = vshrl.u32 %v2934_v47, 16 }
 0x1ef   : > { %v800_v29 = vsel %vm2809_vm11, %v795_v10, %v799_v58  ;;  %v1767_v30 = vcombine.low %v2969_v45, %v906_v20  ;;  %v992_v17 = vsel %vm2805_vm10, %v1778_v21, %v991_v14  ;;  %v818_v31 = vrot.slane %v816_v18, 4 }
 0x1f0   : > { %v809_v26 = vrot.slane %v808_v23, 4  ;;  %v1775_v32 = vcombine.low %v786_v60, %v800_v29  ;;  %v1782_v50 = vcombine.low %v906_v20, %v992_v17  ;;  %v1785_v33 = vcombine.low %v992_v17, %v2815_v51 }
 0x1f1   : > { %1055 = vst.msk [vmem:[#allocation2 + $0x40] sm:$0xff] %vm699_vm12, %v1767_v30  ;;  %v821_v61 = vrot.slane %v819_v22, 5  ;;  %v832_v0 = vrot.slane %v830_v28, 4  ;;  %v833_v16 = vshll.u32 %v2934_v47, 16  ;;  %v839_v51 = vshll.u32 %v1751_v2, 16 }
 0x1f2   : > { %1032 = vrot.lane.b32.xlu0 %v1753_v5, %s2439_s8  ;;  %923 = vrot.lane.b32.xlu1 %v2921_v42, %s2440_s23  ;;  %v814_v39 = vsel %vm2809_vm11, %v809_v26, %v813_v8  ;;  %986 = vst.msk [vmem:[#allocation2 + $0x20] sm:$0xff] %vm699_vm12, %v1775_v32  ;;  %1056 = vst.msk [vmem:[#allocation2 + $0x58] sm:$0xff] %vm699_vm12, %v1785_v33  ;;  %v1771_v11 = vcombine.low %v2917_v37, %v2868_v9  ;;  %v963_v47 = vshrl.u32 %v2875_v15, 16 }
 0x1f3   : > { %v1754_v34 = vcombine.low %v800_v29, %v814_v39  ;;  %v822_v38 = vor.u32 %v821_v61, %v818_v31  ;;  %v835_v40 = vrot.slane %v833_v16, 5  ;;  %v827_v43 = vrot.slane %v825_v25, 5 }
 0x1f4   : > { %v966_v24 = vshll.u32 %v2875_v15, 16  ;;  %v841_v41 = vrot.slane %v839_v51, 5  ;;  %v965_v56 = vrot.slane %v963_v47, 4  ;;  %v972_v1 = vshll.u32 %v2994_v4, 16 }
 0x1f5   : > { %v823_v42 = vrot.slane %v822_v38, 4  ;;  %v836_v49 = vor.u32 %v835_v40, %v832_v0  ;;  %v1732_v53 = vcombine.low %v2799_v19, %v2893_v27  ;;  %v1783_v62 = vcombine.low %v2868_v9, %v2799_v19  ;;  %v1786_v40 = vld [vmem:[#allocation11] ss:$0 sm:$0xff] }
 0x1f6   : > { %1002 = vrot.lane.b32.xlu0 %v1781_v54, %s2441_s28  ;;  %859 = vrot.lane.b32.xlu1 %v1754_v34, %s2441_s28  ;;  %v968_v37 = vrot.slane %v966_v24, 5  ;;  %v974_v27 = vrot.slane %v972_v1, 5 }
 0x1f7   : > { %v828_v15 = vsel %vm2809_vm11, %v823_v42, %v827_v43  ;;  %v837_v55 = vrot.slane %v836_v49, 4  ;;  %700 = vst.msk [vmem:[#allocation2] sm:$0xff] %vm699_vm12, %v1732_v53 }
 0x1f8   : > { %v1776_v57 = vcombine.low %v814_v39, %v828_v15  ;;  %v969_v58 = vor.u32 %v968_v37, %v965_v56  ;;  %v1065_v33 = vld [vmem:[#allocation2 + $0x40] sm:$0xff] }
 0x1f9   : > { %v842_v35 = vsel %vm2809_vm11, %v837_v55, %v841_v41  ;;  %v1068_v61 = vld [vmem:[#allocation2 + $0x58] sm:$0xff] }
 0x1fa   : > { %1034 = vrot.lane.b32.xlu0 %v1754_v34, %s2439_s8  ;;  %925 = vrot.lane.b32.xlu1 %v1767_v30, %s2440_s23  ;;  %v1755_v45 = vcombine.low %v828_v15, %v842_v35  ;;  %987 = vst.msk [vmem:[#allocation2 + $0x38] sm:$0xff] %vm699_vm12, %v1776_v57  ;;  %v970_v54 = vrot.slane %v969_v58, 4  ;;  %v2150_v34 = vld [vmem:[#allocation12 + $0x8] sm:$0xff]  }
 0x1fc   : > { %v975_v59 = vsel %vm2809_vm11, %v970_v54, %v974_v27 }
 0x1fd   : > { %v1777_v60 = vcombine.low %v842_v35, %v975_v59  ;;  %v1784_v63 = vcombine.low %v975_v59, %v2819_v52 }
 0x1fe   : > { %1004 = vrot.lane.b32.xlu0 %v1782_v50, %s2441_s28  ;;  %861 = vrot.lane.b32.xlu1 %v1755_v45, %s2441_s28 }
 0x1ff   : > { %988 = vst.msk [vmem:[#allocation2 + $0x50] sm:$0xff] %vm699_vm12, %v1777_v60 }
 0x202   : > { %1036 = vrot.lane.b32.xlu0 %v1755_v45, %s2439_s8  ;;  %948 = vrot.lane.b32.xlu1 %v1771_v11, %s2439_s8  ;;  %v2149_v11 = vld [vmem:[#allocation12] sm:$0xff]  }
 0x203   : > { %1989 = vmatprep.subr.bf16.mxu0 %v2149_v11 }
 0x204   : > { %1990 = vmatpush3.bf16.msra.mxu0 %v2149_v11 }
 0x205   : > { %1991 = vmatprep.subr.bf16.mxu0 %v2150_v34 }
 0x206   : > { %1021 = vrot.lane.b32.xlu0 %v1783_v62, %s2440_s23 }
 0x208   : > { %1992 = vmatpush3.bf16.msra.mxu0 %v2150_v34 }
 0x20a   : > { %1038 = vrot.lane.b32.xlu0 %v1784_v63, %s2439_s8 }
 0x246   : > { %v945_v44 = vpop.permute.xlu1 %944 }
 0x24a   : > { %v1016_v2 = vpop.permute.xlu1 %1015 }
 0x24e   : > { %v943_v3 = vpop.permute.xlu1 %942 }
 0x24f   : > { %v1001_v5 = vpop.permute.xlu0 %1000 }
 0x250   : > { %1011 = vst.msk [vmem:[#allocation2 + $0x20] sm:$0xff] %vm867_vm13, %v1001_v5 }
 0x254   : > { %v999_v46 = vpop.permute.xlu0 %998  ;;  %v920_v6 = vpop.permute.xlu1 %919 }
 0x255   : > { %1010 = vst.msk [vmem:[#allocation2 + $0x8] sm:$0xff] %vm867_vm13, %v999_v46 }
 0x256   : > { %1027 = vst.msk [vmem:[#allocation2 + $0x8] sm:$0xff] %vm931_vm14, %v1016_v2 }
 0x258   : > { %v1018_v19 = vpop.permute.xlu0 %1017  ;;  %v922_v9 = vpop.permute.xlu1 %921 }
 0x259   : > { %1028 = vst.msk [vmem:[#allocation2 + $0x20] sm:$0xff] %vm931_vm14, %v1018_v19 }
 0x25c   : > { %v1020_v52 = vpop.permute.xlu0 %1019  ;;  %v947_v4 = vpop.permute.xlu1 %946 }
 0x260   : > { %v856_v36 = vpop.permute.xlu0 %855  ;;  %v858_v48 = vpop.permute.xlu1 %857 }
 0x261   : > { %868 = vst.msk [vmem:[#allocation2] sm:$0xff] %vm867_vm13, %v856_v36  ;;  %869 = vst.msk [vmem:[#allocation2 + $0x18] sm:$0xff] %vm867_vm13, %v858_v48 }
 0x262   : > { %932 = vst.msk [vmem:[#allocation2] sm:$0xff] %vm931_vm14, %v920_v6  ;;  %933 = vst.msk [vmem:[#allocation2 + $0x18] sm:$0xff] %vm931_vm14, %v922_v9 }
 0x263   : > { %955 = vst.msk [vmem:[#allocation2] sm:$0xff] %vm954_vm15, %v943_v3  ;;  %956 = vst.msk [vmem:[#allocation2 + $0x18] sm:$0xff] %vm954_vm15, %v945_v44 }
 0x264   : > { %v1033_v8 = vpop.permute.xlu0 %1032  ;;  %v924_v7 = vpop.permute.xlu1 %923 }
 0x265   : > { %1044 = vst.msk [vmem:[#allocation2 + $0x8] sm:$0xff] %vm954_vm15, %v1033_v8 }
 0x268   : > { %v1003_v21 = vpop.permute.xlu0 %1002  ;;  %v860_v10 = vpop.permute.xlu1 %859 }
 0x269   : > { %1012 = vst.msk [vmem:[#allocation2 + $0x38] sm:$0xff] %vm867_vm13, %v1003_v21  ;;  %870 = vst.msk [vmem:[#allocation2 + $0x30] sm:$0xff] %vm867_vm13, %v860_v10 }
 0x26a   : > { %1029 = vst.msk [vmem:[#allocation2 + $0x38] sm:$0xff] %vm931_vm14, %v1020_v52  ;;  %934 = vst.msk [vmem:[#allocation2 + $0x30] sm:$0xff] %vm931_vm14, %v924_v7  ;;  %v1057_v23 = vld [vmem:[#allocation2] sm:$0xff]  ;;  %v1060_v17 = vld [vmem:[#allocation2 + $0x18] sm:$0xff] }
 0x26b   : > { %957 = vst.msk [vmem:[#allocation2 + $0x30] sm:$0xff] %vm954_vm15, %v947_v4 }
 0x26c   : > { %v1035_v14 = vpop.permute.xlu0 %1034  ;;  %v1058_v18 = vld [vmem:[#allocation2 + $0x8] sm:$0xff]  ;;  %v926_v22 = vpop.permute.xlu1 %925 }
 0x26d   : > { %1045 = vst.msk [vmem:[#allocation2 + $0x20] sm:$0xff] %vm954_vm15, %v1035_v14  ;;  %1264 = vmatprep.mubr.bf16.mxu1 %v1058_v18 }
 0x26e   : > { %1265 = vmatmul.mubr.bf16.vlgmr.msra.gmra.mrb[0].mxu1 %v1057_v23 }
 0x26f   : > { %2003 = vmatpush3.bf16.msra.mxu1 %v2779_v12 }
 0x270   : > { %v1005_v20 = vpop.permute.xlu0 %1004  ;;  %v862_v25 = vpop.permute.xlu1 %861  ;;  %2002 = vmatprep.subr.bf16.mxu1 %v2783_v13 }
 0x271   : > { %1013 = vst.msk [vmem:[#allocation2 + $0x50] sm:$0xff] %vm867_vm13, %v1005_v20  ;;  %871 = vst.msk [vmem:[#allocation2 + $0x48] sm:$0xff] %vm867_vm13, %v862_v25 }
 0x272   : > { %935 = vst.msk [vmem:[#allocation2 + $0x48] sm:$0xff] %vm931_vm14, %v926_v22  ;;  %v1063_v32 = vld [vmem:[#allocation2 + $0x30] sm:$0xff] }
 0x273   : > { %2004 = vmatpush3.bf16.msra.mxu1 %v2783_v13 }
 0x274   : > { %v1037_v28 = vpop.permute.xlu0 %1036  ;;  %v1061_v29 = vld [vmem:[#allocation2 + $0x20] sm:$0xff]  ;;  %v949_v30 = vpop.permute.xlu1 %948 }
 0x275   : > { %1046 = vst.msk [vmem:[#allocation2 + $0x38] sm:$0xff] %vm954_vm15, %v1037_v28  ;;  %1272 = vmatprep.mubr.bf16.mxu1 %v1061_v29  ;;  %958 = vst.msk [vmem:[#allocation2 + $0x48] sm:$0xff] %vm954_vm15, %v949_v30 }
 0x276   : > { %1273 = vmatmul.mubr.bf16.gmra.mrb[4].mxu1 %v1060_v17 }
 0x278   : > { %v1022_v12 = vpop.permute.xlu0 %1021 }
 0x279   : > { %1030 = vst.msk [vmem:[#allocation2 + $0x50] sm:$0xff] %vm931_vm14, %v1022_v12 }
 0x27c   : > { %v1039_v31 = vpop.permute.xlu0 %1038  ;;  %v1064_v26 = vld [vmem:[#allocation2 + $0x38] sm:$0xff]  ;;  %v1066_v50 = vld [vmem:[#allocation2 + $0x48] sm:$0xff] }
 0x27d   : > { %1047 = vst.msk [vmem:[#allocation2 + $0x50] sm:$0xff] %vm954_vm15, %v1039_v31  ;;  %1280 = vmatprep.mubr.bf16.mxu1 %v1064_v26 }
 0x27e   : > { %1281 = vmatmul.mubr.bf16.gmra.mrb[8].mxu1 %v1063_v32 }
 0x284   : > { %v1067_v13 = vld [vmem:[#allocation2 + $0x50] sm:$0xff] }
 0x285   : > { %1288 = vmatprep.mubr.bf16.mxu1 %v1067_v13 }
 0x286   : > { %1289 = vmatmul.mubr.bf16.gmra.mrb[12].mxu1 %v1066_v50 }
 0x287   : > { %1985 = vmatprep.mubr.msk.bf16.mxu1 %vm699_vm12, %v1065_v33 }
 0x28e   : > { %1986 = vmatmul.mubr.msk.bf16.vlgmr.msra.gmra.mrb[16].mxu1 %vm699_vm12, %v1068_v61  ;;  %v1883_v61 = vld [vmem:[%s2757_s16 + $0x8] sm:$0xff]  }
 0x2bb   : > { %v1983_v0 = vpop.f32.mrb[8].mxu0 }
 0x2bc   : > { %v1331_v16 = vpop.f32.mrb[9].mxu0 }
 0x2bd   : > { %v1984_v39 = vpop.f32.mrb[10].mxu0 }
 0x2be   : > { %v1334_v51 = vpop.f32.mrb[11].mxu0 }
 0x341   : > { %v1917_v38 = vpop.f32.mrb[0].mxu1 }
 0x342   : > { %v1918_v47 = vpop.f32.mrb[1].mxu1 }
 0x343   : > { %v1919_v43 = vadd.f32 %v1918_v47, %v1917_v38  ;;  %v1920_v24 = vpop.f32.mrb[2].mxu1 }
 0x344   : > { %v1921_v42 = vpop.f32.mrb[3].mxu1 }
 0x345   : > { %v1267_v49 = vadd.f32 %v1919_v43, %v1786_v40  ;;  %v1922_v41 = vadd.f32 %v1921_v42, %v1920_v24 }
 0x347   : > { %v1332_v56 = vadd.f32 %v1331_v16, %v1267_v49  ;;  %v1270_v37 = vadd.f32 %v1922_v41, %v1786_v40  ;;  %v1809_v16 = vld [vmem:[#allocation14] ss:$0 sm:$0xff] }
 0x349   : > { %v1335_v1 = vadd.f32 %v1334_v51, %v1270_v37  ;;  %v1923_v53 = vpop.f32.mrb[4].mxu1  ;;  %v1362_v55 = vmax.f32 %v1332_v56, 0.0 }
 0x34a   : > { %v1924_v15 = vpop.f32.mrb[5].mxu1 }
 0x34b   : > { %v1363_v57 = vmax.f32 %v1335_v1, 0.0  ;;  %v1925_v58 = vadd.f32 %v1924_v15, %v1923_v53  ;;  %v1926_v35 = vpop.f32.mrb[6].mxu1 }
 0x34c   : > { %v1927_v45 = vpop.f32.mrb[7].mxu1 }
 0x34d   : > { %v1370_v54 = vpack.c.bf16 %v1363_v57, %v1362_v55  ;;  %v1275_v27 = vadd.f32 %v1925_v58, %v1786_v40  ;;  %v1928_v59 = vadd.f32 %v1927_v45, %v1926_v35 }
 0x34f   : > { %v1340_v60 = vadd.f32 %v1983_v0, %v1275_v27  ;;  %v1278_v62 = vadd.f32 %v1928_v59, %v1786_v40  ;;  %1993 = vmatprep.mubr.msk.bf16.mxu0 %vm699_vm12, %v1370_v54  ;;  %v1848_v0 = vld [vmem:[%s2757_s16] sm:$0xff]   ;;  %v1885_v54 = vld [vmem:[%s2757_s16 + $0x18] sm:$0xff]   ;;  %v1884_v27 = vld [vmem:[%s2757_s16 + $0x10] sm:$0xff]   ;;  %s2355_s16 = scalar_lea.vmem %s2354_s20, 1024 }
 0x350   : > { %v1849_v11 = vunpack.c.l.bf16 %v1848_v0  ;;  %v1850_v24 = vunpack.c.h.bf16 %v1848_v0  ;;  %v1861_v59 = vunpack.c.l.bf16 %v1885_v54  ;;  %p2357_p3 = scmp.lt.s32.totalorder %s2355_s16, %s2349_s19 }
 0x351   : > { %v1343_v63 = vadd.f32 %v1984_v39, %v1278_v62  ;;  %v1929_v44 = vpop.f32.mrb[8].mxu1  ;;  %v1364_v3 = vmax.f32 %v1340_v60, 0.0  ;;  %v1853_v39 = vunpack.c.l.bf16 %v1883_v61  ;;  %v1857_v62 = vunpack.c.l.bf16 %v1884_v27 }
 0x352   : > { %v1930_v2 = vpop.f32.mrb[9].mxu1  ;;  %p2358_p2 = por %p2357_p3, %p2356_p1 }
 0x353   : > { %v1365_v5 = vmax.f32 %v1343_v63, 0.0  ;;  %v1931_v46 = vadd.f32 %v1930_v2, %v1929_v44  ;;  %v1932_v6 = vpop.f32.mrb[10].mxu1  ;;  %v1862_v2 = vunpack.c.h.bf16 %v1885_v54 }
 0x354   : > { %v1933_v19 = vpop.f32.mrb[11].mxu1  ;;  %p2359_p8 = pnand %p2358_p2, %p2352_p13 }
 0x355   : > { %v1371_v9 = vpack.c.bf16 %v1365_v5, %v1364_v3  ;;  %v1934_v52 = vadd.f32 %v1933_v19, %v1932_v6  ;;  %v1283_v18 = vadd.f32 %v1931_v46, %v1786_v40  ;;  %v1858_v46 = vunpack.c.h.bf16 %v1884_v27 }
 0x357   : > { %1994 = vmatmul.mubr.msk.bf16.vlgmr.msra.gmra.mrb[12].mxu0 %vm699_vm12, %v1371_v9  ;;  %v1286_v29 = vadd.f32 %v1934_v52, %v1786_v40 }
 0x359   : > { %v1935_v4 = vpop.f32.mrb[12].mxu1 }
 0x35a   : > { %v1936_v36 = vpop.f32.mrb[13].mxu1 }
 0x35b   : > { %v1937_v48 = vadd.f32 %v1936_v36, %v1935_v4  ;;  %v1938_v8 = vpop.f32.mrb[14].mxu1 }
 0x35c   : > { %v1939_v7 = vpop.f32.mrb[15].mxu1 }
 0x35d   : > { %v1940_v21 = vadd.f32 %v1939_v7, %v1938_v8  ;;  %v1291_v10 = vadd.f32 %v1937_v48, %v1786_v40 }
 0x35f   : > { %v1294_v20 = vadd.f32 %v1940_v21, %v1786_v40  ;;  %v1854_v40 = vunpack.c.h.bf16 %v1883_v61 }
 0x361   : > { %v1987_v14 = vpop.f32.mrb[16].mxu1 }
 0x362   : > { %v1356_v22 = vadd.f32 %v1987_v14, %v1291_v10  ;;  %v1347_v23 = vpop.f32.mrb[17].mxu1 }
 0x363   : > { %v1348_v25 = vadd.f32 %v1347_v23, %v1283_v18  ;;  %v1988_v28 = vpop.f32.mrb[18].mxu1 }
 0x364   : > { %v1359_v30 = vadd.f32 %v1988_v28, %v1294_v20  ;;  %v1350_v17 = vpop.f32.mrb[19].mxu1  ;;  %v1368_v31 = vmax.f32 %v1356_v22, 0.0 }
 0x365   : > { %v1351_v12 = vadd.f32 %v1350_v17, %v1286_v29  ;;  %v1366_v32 = vmax.f32 %v1348_v25, 0.0 }
 0x366   : > { %v1369_v26 = vmax.f32 %v1359_v30, 0.0 }
 0x367   : > { %v1367_v13 = vmax.f32 %v1351_v12, 0.0 }
 0x368   : > { %v1373_v50 = vpack.c.bf16 %v1369_v26, %v1368_v31 }
 0x369   : > { %v1372_v33 = vpack.c.bf16 %v1367_v13, %v1366_v32 }
 0x36b   : > { %1997 = vmatprep.mubr.msk.bf16.mxu0 %vm699_vm12, %v1372_v33 }
 0x36c   : > { %1998 = vmatmul.mubr.msk.bf16.gmra.mrb[16].mxu0 %vm699_vm12, %v1373_v50 }
 0x42a   : > { %v1995_v51 = vpop.f32.mrb[12].mxu0 }
 0x42b   : > { %v1452_v34 = vadd.f32 %v1995_v51, %v1809_v16  ;;  %v1443_v38 = vpop.f32.mrb[13].mxu0 }
 0x42c   : > { %v1444_v47 = vadd.f32 %v1809_v16, %v1443_v38  ;;  %v1996_v43 = vpop.f32.mrb[14].mxu0 }
 0x42d   : > { %v1492_v42 = vadd.f32 %v1853_v39, %v1452_v34  ;;  %v1455_v49 = vadd.f32 %v1996_v43, %v1809_v16  ;;  %v1446_v41 = vpop.f32.mrb[15].mxu0 }
 0x42e   : > { %v1490_v56 = vadd.f32 %v1849_v11, %v1444_v47  ;;  %v1447_v37 = vadd.f32 %v1809_v16, %v1446_v41 }
 0x42f   : > { %v1493_v1 = vadd.f32 %v1854_v40, %v1455_v49  ;;  %v1500_v15 = vmax.f32 %v1492_v42, 0.0 }
 0x430   : > { %v1491_v53 = vadd.f32 %v1850_v24, %v1447_v37  ;;  %v1498_v57 = vmax.f32 %v1490_v56, 0.0 }
 0x431   : > { %v1501_v55 = vmax.f32 %v1493_v1, 0.0 }
 0x432   : > { %v1499_v58 = vmax.f32 %v1491_v53, 0.0 }
 0x433   : > { %v1871_v35 = vpack.c.bf16 %v1501_v55, %v1500_v15 }
 0x434   : > { %v1866_v45 = vpack.c.bf16 %v1499_v58, %v1498_v57 }
 0x435   : > { %1886 = vst [vmem:[%s3091_s15 + $0x8] sm:$0xff] %v1871_v35  }
 0x436   : > { %1867 = vst [vmem:[%s3091_s15] sm:$0xff] %v1866_v45  }
 0x43f   : > { %v1999_v60 = vpop.f32.mrb[16].mxu0 }
 0x440   : > { %v1468_v63 = vadd.f32 %v1999_v60, %v1809_v16  ;;  %v1459_v44 = vpop.f32.mrb[17].mxu0 }
 0x441   : > { %v1460_v3 = vadd.f32 %v1809_v16, %v1459_v44  ;;  %v2000_v5 = vpop.f32.mrb[18].mxu0 }
 0x442   : > { %v1496_v6 = vadd.f32 %v1861_v59, %v1468_v63  ;;  %v1471_v19 = vadd.f32 %v2000_v5, %v1809_v16  ;;  %v1462_v9 = vpop.f32.mrb[19].mxu0 }
 0x443   : > { %v1494_v52 = vadd.f32 %v1857_v62, %v1460_v3  ;;  %v1463_v4 = vadd.f32 %v1809_v16, %v1462_v9 }
 0x444   : > { %v1497_v36 = vadd.f32 %v1862_v2, %v1471_v19  ;;  %v1504_v8 = vmax.f32 %v1496_v6, 0.0 }
 0x445   : > { %v1495_v48 = vadd.f32 %v1858_v46, %v1463_v4  ;;  %v1502_v21 = vmax.f32 %v1494_v52, 0.0 }
 0x446   : > { %v1505_v7 = vmax.f32 %v1497_v36, 0.0 }
 0x447   : > { %v1503_v10 = vmax.f32 %v1495_v48, 0.0 }
 0x448   : > { %v1881_v14 = vpack.c.bf16 %v1505_v7, %v1504_v8 }
 0x449   : > { %v1876_v18 = vpack.c.bf16 %v1503_v10, %v1502_v21 }
 0x44a   : > { %1888 = vst [vmem:[%s3091_s15 + $0x18] sm:$0xff] %v1881_v14  }
 0x44b   : > { %1887 = vst [vmem:[%s3091_s15 + $0x10] sm:$0xff] %v1876_v18  }
 0x44c   : > { %2362 = shalt.err (!%p2359_p8)
}
 0x44d   : > { %s2363_s8 = scalar_lea.hbm %s3104_s29, 512  ;;  %s2367_s12 = scalar_lea.hbm %s3159_s7, 1024 }
 0x44e   : > { %p2364_p4 = scmp.ne.s32.totalorder %s3104_s29, %s2363_s8  ;;  %p2368_p0 = scmp.lt.u32.totalorder %s3104_s29, %s3159_s7 }
 0x44f   : > { %p2369_p5 = scmp.lt.u32.totalorder %s2367_s12, %s2363_s8  ;;  %p2371_p6 = scmp.lt.u32.totalorder %s2363_s8, %s3104_s29 }
 0x450   : > { %p2365_p10 = pnand %p2364_p4, %p3189_p9 }
 0x451   : > { %p2370_p7 = por %p2369_p5, %p2368_p0 }
 0x452   : > { %p2366_p11 = pneg %p2365_p10 }
 0x453   : > { %p2372_p12 = por %p2371_p6, %p2370_p7 }
 0x455   : > { %p2373_p13 = pnand %p2372_p12, %p2366_p11 }
 0x457   : > { %2376 = shalt.err (!%p2373_p13)
}
 0x458   : > { %s2443_s19 = smov 4  }
 0x459   : > { %2031 = dma.vmem_to_hbm [thread:$0]  (%p3189_p9), %s3099_s22, 512, %s3104_s29, %s1547_s9, %s2440_s23, %s2440_s23, %s2443_s19  }
 0x45a PF: > { %s1575_s30 = sand.u32 1, %s2415_s24   ;;  %p3190_p1 = scmp.ne.s32.totalorder %s3171_s21, 0 }
 0x45b   : > { %p3191_p3 = scmp.ge.s32.totalorder %s2427_s27, 2  ;;  %s1576_s20 = scalar_lea.sflag [#allocation5], %s1575_s30 }
 0x45d   : > { %p2057_p2 = pnand %p3191_p3, %p3190_p1 }
 0x45f   : > { %2410 = dma.done.wait (!%p2057_p2), %s1576_s20, 512  }
 0x460   : > { %2412 = vsyncadd (!%p2057_p2), %s1576_s20, 4294966784  ;;  %p23_p8 = scmp.ge.s32.totalorder %s2669_s11, 4   ;;  %s3192_s24 = smov %s2419_s25 }
 0x461   : > { %s3193_s25 = smov %s2423_s26  ;;  %s3194_s26 = smov %s2680_s17 }
 0x462   : > { %s3195_s27 = smov %s2669_s11  ;;  %25 = sbr.rel (!%p23_p8) target bundleno = 8 (0x8), region = 117 }
 0x469   :  { %1581 = vsyncpa [#allocation4], 1 }
 0x46a   :  { %1583 = vsyncpa [#allocation4 + $0x1], 1 }
 0x46b   :  { %1584 = vsyncpa [#allocation7], 1 }
 0x46c   :  { %1585 = vsyncpa [#allocation10], 1 }
 0x46d   :  { %1586 = vsyncpa [#allocation13], 1 }
 0x46e   :  { %1587 = vsyncpa [#allocation5], 1 }
 0x46f   :  { %1589 = vsyncpa [#allocation5 + $0x1], 1 }

</bundles_post_ra>
